<compile_context>
chip_gen: v5e
topology: v5e:2x2
jax: 0.10.0
libtpu: 0.0.40
codegen_flags: <defaults>
</compile_context>

<pallas_src>
import functools

import jax
import jax.numpy as jnp
from jax import lax
from jax.experimental import pallas as pl
from jax.experimental.pallas import tpu as pltpu


# --------------------------------------------------------------------------
# Fused Pallas kernel: n_layers LSTM + Linear head, one launch
# --------------------------------------------------------------------------
def _fused_lstm_fc_kernel(*refs, n_layers, seq_len, batch, hidden_dim):
    T, B, H = seq_len, batch, hidden_dim

    # ---- unpack refs: inputs | outputs | scratch -------------------------
    it = iter(refs)
    x_ref = next(it)                                        # (T*B, D) time-major flat, f32
    layer_w = [(next(it), next(it), next(it)) for _ in range(n_layers)]
    wfc_ref, bfc_ref = next(it), next(it)                   # (H, O) bf16, (1, O) f32
    out_fc_ref, h_out_ref, c_out_ref = next(it), next(it), next(it)
    seq_sc = next(it)                                       # (T*B, H) f32 VMEM (flat)

    # Loop-invariant lane mask selecting the g (cell-candidate) gate columns.
    lane = lax.broadcasted_iota(jnp.int32, (B, 4 * H), 1)
    g_mask = (lane >= 2 * H) & (lane < 3 * H)

    layer_in = x_ref[...]                                   # (T*B, D_layer) f32
    for l, (wih_ref, whh_ref, b_ref) in enumerate(layer_w):
        # Hoisted input projection: one parallel MXU matmul with M = T*B,
        # bf16 operands / f32 accumulation, bias folded in.  Off the serial
        # recurrence entirely.
        gx = (jnp.dot(layer_in.astype(jnp.bfloat16), wih_ref[...],
                      preferred_element_type=jnp.float32)
              + b_ref[...])                                 # (T*B, 4H) f32

        whh = whh_ref[...]                                  # (H, 4H) bf16, hoisted
        h = jnp.zeros((B, H), jnp.float32)                  # init_hidden: zeros
        c = jnp.ones((B, H), jnp.float32)                   # init_hidden: zeros + 1

        # Fully unrolled serial time loop; only a single-pass bf16 MXU matmul,
        # one tanh pass + one select pair, and the f*c + i*g combine per step.
        for t in range(T):
            gates = gx[t * B:(t + 1) * B, :] + jnp.dot(
                h.astype(jnp.bfloat16), whh,
                preferred_element_type=jnp.float32)          # (B, 4H) f32
            # Single-EUP-pass activations.  PyTorch gate order: i, f, g, o.
            #   sigmoid(x) = 0.5 * tanh(x/2) + 0.5 on the i/f/o lanes,
            #   tanh(x)                        on the g lanes.
            pre = jnp.where(g_mask, gates, gates * 0.5)
            th = jnp.tanh(pre)
            act = jnp.where(g_mask, th, th * 0.5 + 0.5)
            i_g = act[:, 0 * H:1 * H]
            f_g = act[:, 1 * H:2 * H]
            g_g = act[:, 2 * H:3 * H]
            o_g = act[:, 3 * H:4 * H]
            c = f_g * c + i_g * g_g
            h = o_g * jnp.tanh(c)
            seq_sc[t * B:(t + 1) * B, :] = h                # static store, off chain

        h_out_ref[l] = h                                    # single final-state write
        c_out_ref[l] = c

        # TODO(synk): nn.LSTM inter-layer dropout is identity at inference /
        # p=0; a training-mode mask would need pltpu.prng_seed/prng_random_bits.
        layer_in = seq_sc[...]                              # (T*B, H) input to next layer / head

    # Fused FC head over the last layer's full output sequence.
    out_fc_ref[...] = (jnp.dot(layer_in.astype(jnp.bfloat16), wfc_ref[...],
                               preferred_element_type=jnp.float32)
                       + bfc_ref[...])                      # (T*B, O)


def model_lstm_forward(params, x):
    """x: (B, T, input_size) float32 (batch_first).  Returns (out_final, h_n, c_n)."""
    B, T, D = x.shape
    H = params["hidden_dim"]
    L = params["n_layers"]
    O = params["w_fc_t"].shape[1]

    x_tb = jnp.transpose(x, (1, 0, 2)).reshape(T * B, D)    # time-major, flattened

    inputs = [x_tb]
    for l in range(L):
        inputs += [params[f"w_ih_t{l}"],                    # (D_l, 4H) bf16, pre-transposed
                   params[f"w_hh_t{l}"],                    # (H, 4H)   bf16, pre-transposed
                   params[f"b{l}"]]                         # (1, 4H)   f32, b_ih+b_hh combined
    inputs += [params["w_fc_t"], params["b_fc"]]            # (H, O) bf16, (1, O) f32

    vmem = pl.BlockSpec(memory_space=pltpu.MemorySpace.VMEM)
    kernel = functools.partial(_fused_lstm_fc_kernel, n_layers=L,
                               seq_len=T, batch=B, hidden_dim=H)
    out_fc, h_n, c_n = pl.pallas_call(
        kernel,
        out_shape=(jax.ShapeDtypeStruct((T * B, O), jnp.float32),
                   jax.ShapeDtypeStruct((L, B, H), jnp.float32),
                   jax.ShapeDtypeStruct((L, B, H), jnp.float32)),
        in_specs=[vmem] * len(inputs),
        out_specs=(vmem, vmem, vmem),
        scratch_shapes=[pltpu.VMEM((T * B, H), jnp.float32)],   # flat layer-output seq
    )(*inputs)

    out_final = jnp.transpose(out_fc.reshape(T, B, O), (1, 0, 2))  # (B, T, O)
    return out_final, h_n, c_n


# --------------------------------------------------------------------------
# Parameter init (PyTorch-style U(-1/sqrt(H), 1/sqrt(H))), packed ONCE for the
# kernel: transposed weights as bf16 MXU operands, combined biases in f32.
# --------------------------------------------------------------------------
def init_params(key, input_size, hidden_dim, n_layers, output_size):
    k = 1.0 / jnp.sqrt(jnp.float32(hidden_dim))
    keys = jax.random.split(key, 4 * n_layers + 2)
    u = lambda kk, shape: jax.random.uniform(kk, shape, jnp.float32, -k, k)

    p = dict(hidden_dim=hidden_dim, n_layers=n_layers)
    ki = 0
    for l in range(n_layers):
        d_in = input_size if l == 0 else hidden_dim
        w_ih = u(keys[ki], (4 * hidden_dim, d_in)); ki += 1      # PyTorch layout
        w_hh = u(keys[ki], (4 * hidden_dim, hidden_dim)); ki += 1
        b_ih = u(keys[ki], (4 * hidden_dim,)); ki += 1
        b_hh = u(keys[ki], (4 * hidden_dim,)); ki += 1
        p[f"w_ih_t{l}"] = jnp.transpose(w_ih).astype(jnp.bfloat16)
        p[f"w_hh_t{l}"] = jnp.transpose(w_hh).astype(jnp.bfloat16)
        p[f"b{l}"] = (b_ih + b_hh).reshape(1, 4 * hidden_dim)
    w_fc = u(keys[ki], (output_size, hidden_dim)); ki += 1
    b_fc = u(keys[ki], (output_size,))
    p["w_fc_t"] = jnp.transpose(w_fc).astype(jnp.bfloat16)
    p["b_fc"] = b_fc.reshape(1, output_size)
    return p


# --------------------------------------------------------------------------
# Pure-JAX reference (correctness check).  Same bf16 MXU operand rounding and
# the same bias grouping as the kernel; plain sigmoid/tanh elementwise.
# --------------------------------------------------------------------------
def _lstm_layer_ref(x_tbd, h0, c0, w_ih_t, w_hh_t, b):
    H = h0.shape[-1]

    def step(carry, x_t):
        h, c = carry
        gates = (jnp.dot(x_t.astype(jnp.bfloat16), w_ih_t,
                         preferred_element_type=jnp.float32) + b
                 + jnp.dot(h.astype(jnp.bfloat16), w_hh_t,
                           preferred_element_type=jnp.float32))
        i = jax.nn.sigmoid(gates[:, 0 * H:1 * H])
        f = jax.nn.sigmoid(gates[:, 1 * H:2 * H])
        g = jnp.tanh(gates[:, 2 * H:3 * H])
        o = jax.nn.sigmoid(gates[:, 3 * H:4 * H])
        c_new = f * c + i * g
        h_new = o * jnp.tanh(c_new)
        return (h_new, c_new), h_new

    (hf, cf), out = lax.scan(step, (h0, c0), x_tbd)
    return out, hf, cf


def _model_ref(params, x):
    B, T, _ = x.shape
    H = params["hidden_dim"]
    L = params["n_layers"]
    x_tbd = jnp.transpose(x, (1, 0, 2))
    h0 = jnp.zeros((B, H), jnp.float32)
    c0 = jnp.ones((B, H), jnp.float32)       # init_hidden: cell = zeros + 1
    seq = x_tbd
    hs, cs = [], []
    for l in range(L):
        seq, hf, cf = _lstm_layer_ref(seq, h0, c0, params[f"w_ih_t{l}"],
                                      params[f"w_hh_t{l}"], params[f"b{l}"])
        hs.append(hf); cs.append(cf)
    out_final = (jnp.dot(seq.astype(jnp.bfloat16), params["w_fc_t"],
                         preferred_element_type=jnp.float32) + params["b_fc"])
    return (jnp.transpose(out_final, (1, 0, 2)), jnp.stack(hs), jnp.stack(cs))


# --------------------------------------------------------------------------
if __name__ == "__main__":
    B, T, INPUT, HIDDEN, OUTPUT, N_LAYERS = 2, 8, 8, 32, 4, 2

    key = jax.random.PRNGKey(0)
    pkey, xkey = jax.random.split(key)
    params = init_params(pkey, INPUT, HIDDEN, N_LAYERS, OUTPUT)
    x = jax.random.normal(xkey, (B, T, INPUT), jnp.float32)

    out_final, hidden, cell = model_lstm_forward(params, x)
    jax.block_until_ready(out_final)

    # Correctness vs pure-JAX reference.  Both paths use identical bf16 MXU
    # operand rounding; 2e-3 tolerance covers transcendental-implementation /
    # bf16-boundary divergence across the 16-step recurrence (structural bugs
    # produce >= 1e-1 errors).
    r_final, r_hidden, r_cell = _model_ref(params, x)
    import numpy as np
    np.testing.assert_allclose(np.asarray(out_final), np.asarray(r_final),
                               rtol=2e-3, atol=2e-3)
    np.testing.assert_allclose(np.asarray(hidden), np.asarray(r_hidden),
                               rtol=2e-3, atol=2e-3)
    np.testing.assert_allclose(np.asarray(cell), np.asarray(r_cell),
                               rtol=2e-3, atol=2e-3)

    assert out_final.shape == (B, T, OUTPUT)
    assert hidden.shape == (N_LAYERS, B, HIDDEN)
    assert cell.shape == (N_LAYERS, B, HIDDEN)
    print("KERNEL_OK")
</pallas_src>

<mosaic_0001>
module attributes {stable_mosaic.version = 11 : i64} {
  func.func @_fused_lstm_fc_kernel(%arg0: memref<16x8xf32, #tpu.memory_space<vmem>>, %arg1: memref<8x128xbf16, #tpu.memory_space<vmem>>, %arg2: memref<32x128xbf16, #tpu.memory_space<vmem>>, %arg3: memref<1x128xf32, #tpu.memory_space<vmem>>, %arg4: memref<32x128xbf16, #tpu.memory_space<vmem>>, %arg5: memref<32x128xbf16, #tpu.memory_space<vmem>>, %arg6: memref<1x128xf32, #tpu.memory_space<vmem>>, %arg7: memref<32x4xbf16, #tpu.memory_space<vmem>>, %arg8: memref<1x4xf32, #tpu.memory_space<vmem>>, %arg9: memref<16x4xf32, #tpu.memory_space<vmem>>, %arg10: memref<2x2x32xf32, #tpu.memory_space<vmem>>, %arg11: memref<2x2x32xf32, #tpu.memory_space<vmem>>, %arg12: memref<16x32xf32, #tpu.memory_space<vmem>>) attributes {dimension_semantics = [], scalar_prefetch = 0 : i64, scratch_operands = 1 : i64, tpu.core_type = #tpu.core_type<tc>} {
    %0 = tpu.iota {dimensions = array<i32: 1>} : vector<2x128xi32>
    %c64_i32 = arith.constant 64 : i32
    %1 = vector.broadcast %c64_i32 : i32 to vector<2x128xi32>
    %2 = arith.cmpi sge, %0, %1 : vector<2x128xi32>
    %c96_i32 = arith.constant 96 : i32
    %3 = vector.broadcast %c96_i32 : i32 to vector<2x128xi32>
    %4 = arith.cmpi slt, %0, %3 : vector<2x128xi32>
    %5 = arith.andi %2, %4 : vector<2x128xi1>
    %c0 = arith.constant 0 : index
    %c0_0 = arith.constant 0 : index
    %6 = vector.load %arg0[%c0, %c0_0] : memref<16x8xf32, #tpu.memory_space<vmem>>, vector<16x8xf32>
    %7 = arith.truncf %6 : vector<16x8xf32> to vector<16x8xbf16>
    %c0_1 = arith.constant 0 : index
    %c0_2 = arith.constant 0 : index
    %8 = vector.load %arg1[%c0_1, %c0_2] : memref<8x128xbf16, #tpu.memory_space<vmem>>, vector<8x128xbf16>
    %cst = arith.constant dense<0.000000e+00> : vector<16x128xf32>
    %9 = tpu.matmul %7, %8, %cst {dimension_numbers = #tpu.dot_dimension_numbers<[1], [0], [0], [1], [0, 0, 1, 1], [], []>} : vector<16x8xbf16>, vector<8x128xbf16>, vector<16x128xf32> -> vector<16x128xf32>
    %c0_3 = arith.constant 0 : index
    %c0_4 = arith.constant 0 : index
    %10 = vector.load %arg3[%c0_3, %c0_4] : memref<1x128xf32, #tpu.memory_space<vmem>>, vector<1x128xf32>
    %11 = vector.broadcast %10 : vector<1x128xf32> to vector<16x128xf32>
    %12 = arith.addf %9, %11 : vector<16x128xf32>
    %c0_5 = arith.constant 0 : index
    %c0_6 = arith.constant 0 : index
    %13 = vector.load %arg2[%c0_5, %c0_6] : memref<32x128xbf16, #tpu.memory_space<vmem>>, vector<32x128xbf16>
    %cst_7 = arith.constant 0.000000e+00 : f32
    %14 = vector.broadcast %cst_7 : f32 to vector<2x32xf32>
    %cst_8 = arith.constant 1.000000e+00 : f32
    %15 = vector.broadcast %cst_8 : f32 to vector<2x32xf32>
    %16 = vector.extract_strided_slice %12 {offsets = [0, 0], sizes = [2, 128], strides = [1, 1]} : vector<16x128xf32> to vector<2x128xf32>
    %17 = arith.truncf %14 : vector<2x32xf32> to vector<2x32xbf16>
    %cst_9 = arith.constant dense<0.000000e+00> : vector<2x128xf32>
    %18 = tpu.matmul %17, %13, %cst_9 {dimension_numbers = #tpu.dot_dimension_numbers<[1], [0], [0], [1], [0, 0, 1, 1], [], []>} : vector<2x32xbf16>, vector<32x128xbf16>, vector<2x128xf32> -> vector<2x128xf32>
    %19 = arith.addf %16, %18 : vector<2x128xf32>
    %cst_10 = arith.constant 5.000000e-01 : f32
    %20 = vector.broadcast %cst_10 : f32 to vector<2x128xf32>
    %21 = arith.mulf %19, %20 : vector<2x128xf32>
    %22 = arith.select %5, %19, %21 : vector<2x128xi1>, vector<2x128xf32>
    %23 = math.tanh %22 : vector<2x128xf32>
    %cst_11 = arith.constant 5.000000e-01 : f32
    %24 = vector.broadcast %cst_11 : f32 to vector<2x128xf32>
    %25 = arith.mulf %23, %24 : vector<2x128xf32>
    %cst_12 = arith.constant 5.000000e-01 : f32
    %26 = vector.broadcast %cst_12 : f32 to vector<2x128xf32>
    %27 = arith.addf %25, %26 : vector<2x128xf32>
    %28 = arith.select %5, %23, %27 : vector<2x128xi1>, vector<2x128xf32>
    %29 = vector.extract_strided_slice %28 {offsets = [0, 0], sizes = [2, 32], strides = [1, 1]} : vector<2x128xf32> to vector<2x32xf32>
    %30 = vector.extract_strided_slice %28 {offsets = [0, 32], sizes = [2, 32], strides = [1, 1]} : vector<2x128xf32> to vector<2x32xf32>
    %31 = vector.extract_strided_slice %28 {offsets = [0, 64], sizes = [2, 32], strides = [1, 1]} : vector<2x128xf32> to vector<2x32xf32>
    %32 = vector.extract_strided_slice %28 {offsets = [0, 96], sizes = [2, 32], strides = [1, 1]} : vector<2x128xf32> to vector<2x32xf32>
    %33 = arith.mulf %30, %15 : vector<2x32xf32>
    %34 = arith.mulf %29, %31 : vector<2x32xf32>
    %35 = arith.addf %33, %34 : vector<2x32xf32>
    %36 = math.tanh %35 : vector<2x32xf32>
    %37 = arith.mulf %32, %36 : vector<2x32xf32>
    %c0_13 = arith.constant 0 : index
    %c0_14 = arith.constant 0 : index
    %38 = vector.load %arg12[%c0_13, %c0_14] : memref<16x32xf32, #tpu.memory_space<vmem>>, vector<2x32xf32>
    tpu.vector_store %arg12[%c0_13, %c0_14], %37 {strides = array<i32>} : memref<16x32xf32, #tpu.memory_space<vmem>>, vector<2x32xf32>,
    %39 = vector.extract_strided_slice %12 {offsets = [2, 0], sizes = [2, 128], strides = [1, 1]} : vector<16x128xf32> to vector<2x128xf32>
    %40 = arith.truncf %37 : vector<2x32xf32> to vector<2x32xbf16>
    %cst_15 = arith.constant dense<0.000000e+00> : vector<2x128xf32>
    %41 = tpu.matmul %40, %13, %cst_15 {dimension_numbers = #tpu.dot_dimension_numbers<[1], [0], [0], [1], [0, 0, 1, 1], [], []>} : vector<2x32xbf16>, vector<32x128xbf16>, vector<2x128xf32> -> vector<2x128xf32>
    %42 = arith.addf %39, %41 : vector<2x128xf32>
    %cst_16 = arith.constant 5.000000e-01 : f32
    %43 = vector.broadcast %cst_16 : f32 to vector<2x128xf32>
    %44 = arith.mulf %42, %43 : vector<2x128xf32>
    %45 = arith.select %5, %42, %44 : vector<2x128xi1>, vector<2x128xf32>
    %46 = math.tanh %45 : vector<2x128xf32>
    %cst_17 = arith.constant 5.000000e-01 : f32
    %47 = vector.broadcast %cst_17 : f32 to vector<2x128xf32>
    %48 = arith.mulf %46, %47 : vector<2x128xf32>
    %cst_18 = arith.constant 5.000000e-01 : f32
    %49 = vector.broadcast %cst_18 : f32 to vector<2x128xf32>
    %50 = arith.addf %48, %49 : vector<2x128xf32>
    %51 = arith.select %5, %46, %50 : vector<2x128xi1>, vector<2x128xf32>
    %52 = vector.extract_strided_slice %51 {offsets = [0, 0], sizes = [2, 32], strides = [1, 1]} : vector<2x128xf32> to vector<2x32xf32>
    %53 = vector.extract_strided_slice %51 {offsets = [0, 32], sizes = [2, 32], strides = [1, 1]} : vector<2x128xf32> to vector<2x32xf32>
    %54 = vector.extract_strided_slice %51 {offsets = [0, 64], sizes = [2, 32], strides = [1, 1]} : vector<2x128xf32> to vector<2x32xf32>
    %55 = vector.extract_strided_slice %51 {offsets = [0, 96], sizes = [2, 32], strides = [1, 1]} : vector<2x128xf32> to vector<2x32xf32>
    %56 = arith.mulf %53, %35 : vector<2x32xf32>
    %57 = arith.mulf %52, %54 : vector<2x32xf32>
    %58 = arith.addf %56, %57 : vector<2x32xf32>
    %59 = math.tanh %58 : vector<2x32xf32>
    %60 = arith.mulf %55, %59 : vector<2x32xf32>
    %c2 = arith.constant 2 : index
    %c0_19 = arith.constant 0 : index
    %61 = vector.load %arg12[%c2, %c0_19] : memref<16x32xf32, #tpu.memory_space<vmem>>, vector<2x32xf32>
    tpu.vector_store %arg12[%c2, %c0_19], %60 {strides = array<i32>} : memref<16x32xf32, #tpu.memory_space<vmem>>, vector<2x32xf32>,
    %62 = vector.extract_strided_slice %12 {offsets = [4, 0], sizes = [2, 128], strides = [1, 1]} : vector<16x128xf32> to vector<2x128xf32>
    %63 = arith.truncf %60 : vector<2x32xf32> to vector<2x32xbf16>
    %cst_20 = arith.constant dense<0.000000e+00> : vector<2x128xf32>
    %64 = tpu.matmul %63, %13, %cst_20 {dimension_numbers = #tpu.dot_dimension_numbers<[1], [0], [0], [1], [0, 0, 1, 1], [], []>} : vector<2x32xbf16>, vector<32x128xbf16>, vector<2x128xf32> -> vector<2x128xf32>
    %65 = arith.addf %62, %64 : vector<2x128xf32>
    %cst_21 = arith.constant 5.000000e-01 : f32
    %66 = vector.broadcast %cst_21 : f32 to vector<2x128xf32>
    %67 = arith.mulf %65, %66 : vector<2x128xf32>
    %68 = arith.select %5, %65, %67 : vector<2x128xi1>, vector<2x128xf32>
    %69 = math.tanh %68 : vector<2x128xf32>
    %cst_22 = arith.constant 5.000000e-01 : f32
    %70 = vector.broadcast %cst_22 : f32 to vector<2x128xf32>
    %71 = arith.mulf %69, %70 : vector<2x128xf32>
    %cst_23 = arith.constant 5.000000e-01 : f32
    %72 = vector.broadcast %cst_23 : f32 to vector<2x128xf32>
    %73 = arith.addf %71, %72 : vector<2x128xf32>
    %74 = arith.select %5, %69, %73 : vector<2x128xi1>, vector<2x128xf32>
    %75 = vector.extract_strided_slice %74 {offsets = [0, 0], sizes = [2, 32], strides = [1, 1]} : vector<2x128xf32> to vector<2x32xf32>
    %76 = vector.extract_strided_slice %74 {offsets = [0, 32], sizes = [2, 32], strides = [1, 1]} : vector<2x128xf32> to vector<2x32xf32>
    %77 = vector.extract_strided_slice %74 {offsets = [0, 64], sizes = [2, 32], strides = [1, 1]} : vector<2x128xf32> to vector<2x32xf32>
    %78 = vector.extract_strided_slice %74 {offsets = [0, 96], sizes = [2, 32], strides = [1, 1]} : vector<2x128xf32> to vector<2x32xf32>
    %79 = arith.mulf %76, %58 : vector<2x32xf32>
    %80 = arith.mulf %75, %77 : vector<2x32xf32>
    %81 = arith.addf %79, %80 : vector<2x32xf32>
    %82 = math.tanh %81 : vector<2x32xf32>
    %83 = arith.mulf %78, %82 : vector<2x32xf32>
    %c4 = arith.constant 4 : index
    %c0_24 = arith.constant 0 : index
    %84 = vector.load %arg12[%c4, %c0_24] : memref<16x32xf32, #tpu.memory_space<vmem>>, vector<2x32xf32>
    tpu.vector_store %arg12[%c4, %c0_24], %83 {strides = array<i32>} : memref<16x32xf32, #tpu.memory_space<vmem>>, vector<2x32xf32>,
    %85 = vector.extract_strided_slice %12 {offsets = [6, 0], sizes = [2, 128], strides = [1, 1]} : vector<16x128xf32> to vector<2x128xf32>
    %86 = arith.truncf %83 : vector<2x32xf32> to vector<2x32xbf16>
    %cst_25 = arith.constant dense<0.000000e+00> : vector<2x128xf32>
    %87 = tpu.matmul %86, %13, %cst_25 {dimension_numbers = #tpu.dot_dimension_numbers<[1], [0], [0], [1], [0, 0, 1, 1], [], []>} : vector<2x32xbf16>, vector<32x128xbf16>, vector<2x128xf32> -> vector<2x128xf32>
    %88 = arith.addf %85, %87 : vector<2x128xf32>
    %cst_26 = arith.constant 5.000000e-01 : f32
    %89 = vector.broadcast %cst_26 : f32 to vector<2x128xf32>
    %90 = arith.mulf %88, %89 : vector<2x128xf32>
    %91 = arith.select %5, %88, %90 : vector<2x128xi1>, vector<2x128xf32>
    %92 = math.tanh %91 : vector<2x128xf32>
    %cst_27 = arith.constant 5.000000e-01 : f32
    %93 = vector.broadcast %cst_27 : f32 to vector<2x128xf32>
    %94 = arith.mulf %92, %93 : vector<2x128xf32>
    %cst_28 = arith.constant 5.000000e-01 : f32
    %95 = vector.broadcast %cst_28 : f32 to vector<2x128xf32>
    %96 = arith.addf %94, %95 : vector<2x128xf32>
    %97 = arith.select %5, %92, %96 : vector<2x128xi1>, vector<2x128xf32>
    %98 = vector.extract_strided_slice %97 {offsets = [0, 0], sizes = [2, 32], strides = [1, 1]} : vector<2x128xf32> to vector<2x32xf32>
    %99 = vector.extract_strided_slice %97 {offsets = [0, 32], sizes = [2, 32], strides = [1, 1]} : vector<2x128xf32> to vector<2x32xf32>
    %100 = vector.extract_strided_slice %97 {offsets = [0, 64], sizes = [2, 32], strides = [1, 1]} : vector<2x128xf32> to vector<2x32xf32>
    %101 = vector.extract_strided_slice %97 {offsets = [0, 96], sizes = [2, 32], strides = [1, 1]} : vector<2x128xf32> to vector<2x32xf32>
    %102 = arith.mulf %99, %81 : vector<2x32xf32>
    %103 = arith.mulf %98, %100 : vector<2x32xf32>
    %104 = arith.addf %102, %103 : vector<2x32xf32>
    %105 = math.tanh %104 : vector<2x32xf32>
    %106 = arith.mulf %101, %105 : vector<2x32xf32>
    %c6 = arith.constant 6 : index
    %c0_29 = arith.constant 0 : index
    %107 = vector.load %arg12[%c6, %c0_29] : memref<16x32xf32, #tpu.memory_space<vmem>>, vector<2x32xf32>
    tpu.vector_store %arg12[%c6, %c0_29], %106 {strides = array<i32>} : memref<16x32xf32, #tpu.memory_space<vmem>>, vector<2x32xf32>,
    %108 = vector.extract_strided_slice %12 {offsets = [8, 0], sizes = [2, 128], strides = [1, 1]} : vector<16x128xf32> to vector<2x128xf32>
    %109 = arith.truncf %106 : vector<2x32xf32> to vector<2x32xbf16>
    %cst_30 = arith.constant dense<0.000000e+00> : vector<2x128xf32>
    %110 = tpu.matmul %109, %13, %cst_30 {dimension_numbers = #tpu.dot_dimension_numbers<[1], [0], [0], [1], [0, 0, 1, 1], [], []>} : vector<2x32xbf16>, vector<32x128xbf16>, vector<2x128xf32> -> vector<2x128xf32>
    %111 = arith.addf %108, %110 : vector<2x128xf32>
    %cst_31 = arith.constant 5.000000e-01 : f32
    %112 = vector.broadcast %cst_31 : f32 to vector<2x128xf32>
    %113 = arith.mulf %111, %112 : vector<2x128xf32>
    %114 = arith.select %5, %111, %113 : vector<2x128xi1>, vector<2x128xf32>
    %115 = math.tanh %114 : vector<2x128xf32>
    %cst_32 = arith.constant 5.000000e-01 : f32
    %116 = vector.broadcast %cst_32 : f32 to vector<2x128xf32>
    %117 = arith.mulf %115, %116 : vector<2x128xf32>
    %cst_33 = arith.constant 5.000000e-01 : f32
    %118 = vector.broadcast %cst_33 : f32 to vector<2x128xf32>
    %119 = arith.addf %117, %118 : vector<2x128xf32>
    %120 = arith.select %5, %115, %119 : vector<2x128xi1>, vector<2x128xf32>
    %121 = vector.extract_strided_slice %120 {offsets = [0, 0], sizes = [2, 32], strides = [1, 1]} : vector<2x128xf32> to vector<2x32xf32>
    %122 = vector.extract_strided_slice %120 {offsets = [0, 32], sizes = [2, 32], strides = [1, 1]} : vector<2x128xf32> to vector<2x32xf32>
    %123 = vector.extract_strided_slice %120 {offsets = [0, 64], sizes = [2, 32], strides = [1, 1]} : vector<2x128xf32> to vector<2x32xf32>
    %124 = vector.extract_strided_slice %120 {offsets = [0, 96], sizes = [2, 32], strides = [1, 1]} : vector<2x128xf32> to vector<2x32xf32>
    %125 = arith.mulf %122, %104 : vector<2x32xf32>
    %126 = arith.mulf %121, %123 : vector<2x32xf32>
    %127 = arith.addf %125, %126 : vector<2x32xf32>
    %128 = math.tanh %127 : vector<2x32xf32>
    %129 = arith.mulf %124, %128 : vector<2x32xf32>
    %c8 = arith.constant 8 : index
    %c0_34 = arith.constant 0 : index
    %130 = vector.load %arg12[%c8, %c0_34] : memref<16x32xf32, #tpu.memory_space<vmem>>, vector<2x32xf32>
    tpu.vector_store %arg12[%c8, %c0_34], %129 {strides = array<i32>} : memref<16x32xf32, #tpu.memory_space<vmem>>, vector<2x32xf32>,
    %131 = vector.extract_strided_slice %12 {offsets = [10, 0], sizes = [2, 128], strides = [1, 1]} : vector<16x128xf32> to vector<2x128xf32>
    %132 = arith.truncf %129 : vector<2x32xf32> to vector<2x32xbf16>
    %cst_35 = arith.constant dense<0.000000e+00> : vector<2x128xf32>
    %133 = tpu.matmul %132, %13, %cst_35 {dimension_numbers = #tpu.dot_dimension_numbers<[1], [0], [0], [1], [0, 0, 1, 1], [], []>} : vector<2x32xbf16>, vector<32x128xbf16>, vector<2x128xf32> -> vector<2x128xf32>
    %134 = arith.addf %131, %133 : vector<2x128xf32>
    %cst_36 = arith.constant 5.000000e-01 : f32
    %135 = vector.broadcast %cst_36 : f32 to vector<2x128xf32>
    %136 = arith.mulf %134, %135 : vector<2x128xf32>
    %137 = arith.select %5, %134, %136 : vector<2x128xi1>, vector<2x128xf32>
    %138 = math.tanh %137 : vector<2x128xf32>
    %cst_37 = arith.constant 5.000000e-01 : f32
    %139 = vector.broadcast %cst_37 : f32 to vector<2x128xf32>
    %140 = arith.mulf %138, %139 : vector<2x128xf32>
    %cst_38 = arith.constant 5.000000e-01 : f32
    %141 = vector.broadcast %cst_38 : f32 to vector<2x128xf32>
    %142 = arith.addf %140, %141 : vector<2x128xf32>
    %143 = arith.select %5, %138, %142 : vector<2x128xi1>, vector<2x128xf32>
    %144 = vector.extract_strided_slice %143 {offsets = [0, 0], sizes = [2, 32], strides = [1, 1]} : vector<2x128xf32> to vector<2x32xf32>
    %145 = vector.extract_strided_slice %143 {offsets = [0, 32], sizes = [2, 32], strides = [1, 1]} : vector<2x128xf32> to vector<2x32xf32>
    %146 = vector.extract_strided_slice %143 {offsets = [0, 64], sizes = [2, 32], strides = [1, 1]} : vector<2x128xf32> to vector<2x32xf32>
    %147 = vector.extract_strided_slice %143 {offsets = [0, 96], sizes = [2, 32], strides = [1, 1]} : vector<2x128xf32> to vector<2x32xf32>
    %148 = arith.mulf %145, %127 : vector<2x32xf32>
    %149 = arith.mulf %144, %146 : vector<2x32xf32>
    %150 = arith.addf %148, %149 : vector<2x32xf32>
    %151 = math.tanh %150 : vector<2x32xf32>
    %152 = arith.mulf %147, %151 : vector<2x32xf32>
    %c10 = arith.constant 10 : index
    %c0_39 = arith.constant 0 : index
    %153 = vector.load %arg12[%c10, %c0_39] : memref<16x32xf32, #tpu.memory_space<vmem>>, vector<2x32xf32>
    tpu.vector_store %arg12[%c10, %c0_39], %152 {strides = array<i32>} : memref<16x32xf32, #tpu.memory_space<vmem>>, vector<2x32xf32>,
    %154 = vector.extract_strided_slice %12 {offsets = [12, 0], sizes = [2, 128], strides = [1, 1]} : vector<16x128xf32> to vector<2x128xf32>
    %155 = arith.truncf %152 : vector<2x32xf32> to vector<2x32xbf16>
    %cst_40 = arith.constant dense<0.000000e+00> : vector<2x128xf32>
    %156 = tpu.matmul %155, %13, %cst_40 {dimension_numbers = #tpu.dot_dimension_numbers<[1], [0], [0], [1], [0, 0, 1, 1], [], []>} : vector<2x32xbf16>, vector<32x128xbf16>, vector<2x128xf32> -> vector<2x128xf32>
    %157 = arith.addf %154, %156 : vector<2x128xf32>
    %cst_41 = arith.constant 5.000000e-01 : f32
    %158 = vector.broadcast %cst_41 : f32 to vector<2x128xf32>
    %159 = arith.mulf %157, %158 : vector<2x128xf32>
    %160 = arith.select %5, %157, %159 : vector<2x128xi1>, vector<2x128xf32>
    %161 = math.tanh %160 : vector<2x128xf32>
    %cst_42 = arith.constant 5.000000e-01 : f32
    %162 = vector.broadcast %cst_42 : f32 to vector<2x128xf32>
    %163 = arith.mulf %161, %162 : vector<2x128xf32>
    %cst_43 = arith.constant 5.000000e-01 : f32
    %164 = vector.broadcast %cst_43 : f32 to vector<2x128xf32>
    %165 = arith.addf %163, %164 : vector<2x128xf32>
    %166 = arith.select %5, %161, %165 : vector<2x128xi1>, vector<2x128xf32>
    %167 = vector.extract_strided_slice %166 {offsets = [0, 0], sizes = [2, 32], strides = [1, 1]} : vector<2x128xf32> to vector<2x32xf32>
    %168 = vector.extract_strided_slice %166 {offsets = [0, 32], sizes = [2, 32], strides = [1, 1]} : vector<2x128xf32> to vector<2x32xf32>
    %169 = vector.extract_strided_slice %166 {offsets = [0, 64], sizes = [2, 32], strides = [1, 1]} : vector<2x128xf32> to vector<2x32xf32>
    %170 = vector.extract_strided_slice %166 {offsets = [0, 96], sizes = [2, 32], strides = [1, 1]} : vector<2x128xf32> to vector<2x32xf32>
    %171 = arith.mulf %168, %150 : vector<2x32xf32>
    %172 = arith.mulf %167, %169 : vector<2x32xf32>
    %173 = arith.addf %171, %172 : vector<2x32xf32>
    %174 = math.tanh %173 : vector<2x32xf32>
    %175 = arith.mulf %170, %174 : vector<2x32xf32>
    %c12 = arith.constant 12 : index
    %c0_44 = arith.constant 0 : index
    %176 = vector.load %arg12[%c12, %c0_44] : memref<16x32xf32, #tpu.memory_space<vmem>>, vector<2x32xf32>
    tpu.vector_store %arg12[%c12, %c0_44], %175 {strides = array<i32>} : memref<16x32xf32, #tpu.memory_space<vmem>>, vector<2x32xf32>,
    %177 = vector.extract_strided_slice %12 {offsets = [14, 0], sizes = [2, 128], strides = [1, 1]} : vector<16x128xf32> to vector<2x128xf32>
    %178 = arith.truncf %175 : vector<2x32xf32> to vector<2x32xbf16>
    %cst_45 = arith.constant dense<0.000000e+00> : vector<2x128xf32>
    %179 = tpu.matmul %178, %13, %cst_45 {dimension_numbers = #tpu.dot_dimension_numbers<[1], [0], [0], [1], [0, 0, 1, 1], [], []>} : vector<2x32xbf16>, vector<32x128xbf16>, vector<2x128xf32> -> vector<2x128xf32>
    %180 = arith.addf %177, %179 : vector<2x128xf32>
    %cst_46 = arith.constant 5.000000e-01 : f32
    %181 = vector.broadcast %cst_46 : f32 to vector<2x128xf32>
    %182 = arith.mulf %180, %181 : vector<2x128xf32>
    %183 = arith.select %5, %180, %182 : vector<2x128xi1>, vector<2x128xf32>
    %184 = math.tanh %183 : vector<2x128xf32>
    %cst_47 = arith.constant 5.000000e-01 : f32
    %185 = vector.broadcast %cst_47 : f32 to vector<2x128xf32>
    %186 = arith.mulf %184, %185 : vector<2x128xf32>
    %cst_48 = arith.constant 5.000000e-01 : f32
    %187 = vector.broadcast %cst_48 : f32 to vector<2x128xf32>
    %188 = arith.addf %186, %187 : vector<2x128xf32>
    %189 = arith.select %5, %184, %188 : vector<2x128xi1>, vector<2x128xf32>
    %190 = vector.extract_strided_slice %189 {offsets = [0, 0], sizes = [2, 32], strides = [1, 1]} : vector<2x128xf32> to vector<2x32xf32>
    %191 = vector.extract_strided_slice %189 {offsets = [0, 32], sizes = [2, 32], strides = [1, 1]} : vector<2x128xf32> to vector<2x32xf32>
    %192 = vector.extract_strided_slice %189 {offsets = [0, 64], sizes = [2, 32], strides = [1, 1]} : vector<2x128xf32> to vector<2x32xf32>
    %193 = vector.extract_strided_slice %189 {offsets = [0, 96], sizes = [2, 32], strides = [1, 1]} : vector<2x128xf32> to vector<2x32xf32>
    %194 = arith.mulf %191, %173 : vector<2x32xf32>
    %195 = arith.mulf %190, %192 : vector<2x32xf32>
    %196 = arith.addf %194, %195 : vector<2x32xf32>
    %197 = math.tanh %196 : vector<2x32xf32>
    %198 = arith.mulf %193, %197 : vector<2x32xf32>
    %c14 = arith.constant 14 : index
    %c0_49 = arith.constant 0 : index
    %199 = vector.load %arg12[%c14, %c0_49] : memref<16x32xf32, #tpu.memory_space<vmem>>, vector<2x32xf32>
    tpu.vector_store %arg12[%c14, %c0_49], %198 {strides = array<i32>} : memref<16x32xf32, #tpu.memory_space<vmem>>, vector<2x32xf32>,
    %c0_50 = arith.constant 0 : index
    %c0_51 = arith.constant 0 : index
    %c0_52 = arith.constant 0 : index
    %200 = vector.load %arg10[%c0_50, %c0_51, %c0_52] : memref<2x2x32xf32, #tpu.memory_space<vmem>>, vector<1x2x32xf32>
    %201 = vector.shape_cast %200 : vector<1x2x32xf32> to vector<2x32xf32>
    %202 = vector.shape_cast %198 : vector<2x32xf32> to vector<1x2x32xf32>
    tpu.vector_store %arg10[%c0_50, %c0_51, %c0_52], %202 {strides = array<i32>} : memref<2x2x32xf32, #tpu.memory_space<vmem>>, vector<1x2x32xf32>,
    %c0_53 = arith.constant 0 : index
    %c0_54 = arith.constant 0 : index
    %c0_55 = arith.constant 0 : index
    %203 = vector.load %arg11[%c0_53, %c0_54, %c0_55] : memref<2x2x32xf32, #tpu.memory_space<vmem>>, vector<1x2x32xf32>
    %204 = vector.shape_cast %203 : vector<1x2x32xf32> to vector<2x32xf32>
    %205 = vector.shape_cast %196 : vector<2x32xf32> to vector<1x2x32xf32>
    tpu.vector_store %arg11[%c0_53, %c0_54, %c0_55], %205 {strides = array<i32>} : memref<2x2x32xf32, #tpu.memory_space<vmem>>, vector<1x2x32xf32>,
    %c0_56 = arith.constant 0 : index
    %c0_57 = arith.constant 0 : index
    %206 = vector.load %arg12[%c0_56, %c0_57] : memref<16x32xf32, #tpu.memory_space<vmem>>, vector<16x32xf32>
    %207 = arith.truncf %206 : vector<16x32xf32> to vector<16x32xbf16>
    %c0_58 = arith.constant 0 : index
    %c0_59 = arith.constant 0 : index
    %208 = vector.load %arg4[%c0_58, %c0_59] : memref<32x128xbf16, #tpu.memory_space<vmem>>, vector<32x128xbf16>
    %cst_60 = arith.constant dense<0.000000e+00> : vector<16x128xf32>
    %209 = tpu.matmul %207, %208, %cst_60 {dimension_numbers = #tpu.dot_dimension_numbers<[1], [0], [0], [1], [0, 0, 1, 1], [], []>} : vector<16x32xbf16>, vector<32x128xbf16>, vector<16x128xf32> -> vector<16x128xf32>
    %c0_61 = arith.constant 0 : index
    %c0_62 = arith.constant 0 : index
    %210 = vector.load %arg6[%c0_61, %c0_62] : memref<1x128xf32, #tpu.memory_space<vmem>>, vector<1x128xf32>
    %211 = vector.broadcast %210 : vector<1x128xf32> to vector<16x128xf32>
    %212 = arith.addf %209, %211 : vector<16x128xf32>
    %c0_63 = arith.constant 0 : index
    %c0_64 = arith.constant 0 : index
    %213 = vector.load %arg5[%c0_63, %c0_64] : memref<32x128xbf16, #tpu.memory_space<vmem>>, vector<32x128xbf16>
    %cst_65 = arith.constant 0.000000e+00 : f32
    %214 = vector.broadcast %cst_65 : f32 to vector<2x32xf32>
    %cst_66 = arith.constant 1.000000e+00 : f32
    %215 = vector.broadcast %cst_66 : f32 to vector<2x32xf32>
    %216 = vector.extract_strided_slice %212 {offsets = [0, 0], sizes = [2, 128], strides = [1, 1]} : vector<16x128xf32> to vector<2x128xf32>
    %217 = arith.truncf %214 : vector<2x32xf32> to vector<2x32xbf16>
    %cst_67 = arith.constant dense<0.000000e+00> : vector<2x128xf32>
    %218 = tpu.matmul %217, %213, %cst_67 {dimension_numbers = #tpu.dot_dimension_numbers<[1], [0], [0], [1], [0, 0, 1, 1], [], []>} : vector<2x32xbf16>, vector<32x128xbf16>, vector<2x128xf32> -> vector<2x128xf32>
    %219 = arith.addf %216, %218 : vector<2x128xf32>
    %cst_68 = arith.constant 5.000000e-01 : f32
    %220 = vector.broadcast %cst_68 : f32 to vector<2x128xf32>
    %221 = arith.mulf %219, %220 : vector<2x128xf32>
    %222 = arith.select %5, %219, %221 : vector<2x128xi1>, vector<2x128xf32>
    %223 = math.tanh %222 : vector<2x128xf32>
    %cst_69 = arith.constant 5.000000e-01 : f32
    %224 = vector.broadcast %cst_69 : f32 to vector<2x128xf32>
    %225 = arith.mulf %223, %224 : vector<2x128xf32>
    %cst_70 = arith.constant 5.000000e-01 : f32
    %226 = vector.broadcast %cst_70 : f32 to vector<2x128xf32>
    %227 = arith.addf %225, %226 : vector<2x128xf32>
    %228 = arith.select %5, %223, %227 : vector<2x128xi1>, vector<2x128xf32>
    %229 = vector.extract_strided_slice %228 {offsets = [0, 0], sizes = [2, 32], strides = [1, 1]} : vector<2x128xf32> to vector<2x32xf32>
    %230 = vector.extract_strided_slice %228 {offsets = [0, 32], sizes = [2, 32], strides = [1, 1]} : vector<2x128xf32> to vector<2x32xf32>
    %231 = vector.extract_strided_slice %228 {offsets = [0, 64], sizes = [2, 32], strides = [1, 1]} : vector<2x128xf32> to vector<2x32xf32>
    %232 = vector.extract_strided_slice %228 {offsets = [0, 96], sizes = [2, 32], strides = [1, 1]} : vector<2x128xf32> to vector<2x32xf32>
    %233 = arith.mulf %230, %215 : vector<2x32xf32>
    %234 = arith.mulf %229, %231 : vector<2x32xf32>
    %235 = arith.addf %233, %234 : vector<2x32xf32>
    %236 = math.tanh %235 : vector<2x32xf32>
    %237 = arith.mulf %232, %236 : vector<2x32xf32>
    %c0_71 = arith.constant 0 : index
    %c0_72 = arith.constant 0 : index
    %238 = vector.load %arg12[%c0_71, %c0_72] : memref<16x32xf32, #tpu.memory_space<vmem>>, vector<2x32xf32>
    tpu.vector_store %arg12[%c0_71, %c0_72], %237 {strides = array<i32>} : memref<16x32xf32, #tpu.memory_space<vmem>>, vector<2x32xf32>,
    %239 = vector.extract_strided_slice %212 {offsets = [2, 0], sizes = [2, 128], strides = [1, 1]} : vector<16x128xf32> to vector<2x128xf32>
    %240 = arith.truncf %237 : vector<2x32xf32> to vector<2x32xbf16>
    %cst_73 = arith.constant dense<0.000000e+00> : vector<2x128xf32>
    %241 = tpu.matmul %240, %213, %cst_73 {dimension_numbers = #tpu.dot_dimension_numbers<[1], [0], [0], [1], [0, 0, 1, 1], [], []>} : vector<2x32xbf16>, vector<32x128xbf16>, vector<2x128xf32> -> vector<2x128xf32>
    %242 = arith.addf %239, %241 : vector<2x128xf32>
    %cst_74 = arith.constant 5.000000e-01 : f32
    %243 = vector.broadcast %cst_74 : f32 to vector<2x128xf32>
    %244 = arith.mulf %242, %243 : vector<2x128xf32>
    %245 = arith.select %5, %242, %244 : vector<2x128xi1>, vector<2x128xf32>
    %246 = math.tanh %245 : vector<2x128xf32>
    %cst_75 = arith.constant 5.000000e-01 : f32
    %247 = vector.broadcast %cst_75 : f32 to vector<2x128xf32>
    %248 = arith.mulf %246, %247 : vector<2x128xf32>
    %cst_76 = arith.constant 5.000000e-01 : f32
    %249 = vector.broadcast %cst_76 : f32 to vector<2x128xf32>
    %250 = arith.addf %248, %249 : vector<2x128xf32>
    %251 = arith.select %5, %246, %250 : vector<2x128xi1>, vector<2x128xf32>
    %252 = vector.extract_strided_slice %251 {offsets = [0, 0], sizes = [2, 32], strides = [1, 1]} : vector<2x128xf32> to vector<2x32xf32>
    %253 = vector.extract_strided_slice %251 {offsets = [0, 32], sizes = [2, 32], strides = [1, 1]} : vector<2x128xf32> to vector<2x32xf32>
    %254 = vector.extract_strided_slice %251 {offsets = [0, 64], sizes = [2, 32], strides = [1, 1]} : vector<2x128xf32> to vector<2x32xf32>
    %255 = vector.extract_strided_slice %251 {offsets = [0, 96], sizes = [2, 32], strides = [1, 1]} : vector<2x128xf32> to vector<2x32xf32>
    %256 = arith.mulf %253, %235 : vector<2x32xf32>
    %257 = arith.mulf %252, %254 : vector<2x32xf32>
    %258 = arith.addf %256, %257 : vector<2x32xf32>
    %259 = math.tanh %258 : vector<2x32xf32>
    %260 = arith.mulf %255, %259 : vector<2x32xf32>
    %c2_77 = arith.constant 2 : index
    %c0_78 = arith.constant 0 : index
    %261 = vector.load %arg12[%c2_77, %c0_78] : memref<16x32xf32, #tpu.memory_space<vmem>>, vector<2x32xf32>
    tpu.vector_store %arg12[%c2_77, %c0_78], %260 {strides = array<i32>} : memref<16x32xf32, #tpu.memory_space<vmem>>, vector<2x32xf32>,
    %262 = vector.extract_strided_slice %212 {offsets = [4, 0], sizes = [2, 128], strides = [1, 1]} : vector<16x128xf32> to vector<2x128xf32>
    %263 = arith.truncf %260 : vector<2x32xf32> to vector<2x32xbf16>
    %cst_79 = arith.constant dense<0.000000e+00> : vector<2x128xf32>
    %264 = tpu.matmul %263, %213, %cst_79 {dimension_numbers = #tpu.dot_dimension_numbers<[1], [0], [0], [1], [0, 0, 1, 1], [], []>} : vector<2x32xbf16>, vector<32x128xbf16>, vector<2x128xf32> -> vector<2x128xf32>
    %265 = arith.addf %262, %264 : vector<2x128xf32>
    %cst_80 = arith.constant 5.000000e-01 : f32
    %266 = vector.broadcast %cst_80 : f32 to vector<2x128xf32>
    %267 = arith.mulf %265, %266 : vector<2x128xf32>
    %268 = arith.select %5, %265, %267 : vector<2x128xi1>, vector<2x128xf32>
    %269 = math.tanh %268 : vector<2x128xf32>
    %cst_81 = arith.constant 5.000000e-01 : f32
    %270 = vector.broadcast %cst_81 : f32 to vector<2x128xf32>
    %271 = arith.mulf %269, %270 : vector<2x128xf32>
    %cst_82 = arith.constant 5.000000e-01 : f32
    %272 = vector.broadcast %cst_82 : f32 to vector<2x128xf32>
    %273 = arith.addf %271, %272 : vector<2x128xf32>
    %274 = arith.select %5, %269, %273 : vector<2x128xi1>, vector<2x128xf32>
    %275 = vector.extract_strided_slice %274 {offsets = [0, 0], sizes = [2, 32], strides = [1, 1]} : vector<2x128xf32> to vector<2x32xf32>
    %276 = vector.extract_strided_slice %274 {offsets = [0, 32], sizes = [2, 32], strides = [1, 1]} : vector<2x128xf32> to vector<2x32xf32>
    %277 = vector.extract_strided_slice %274 {offsets = [0, 64], sizes = [2, 32], strides = [1, 1]} : vector<2x128xf32> to vector<2x32xf32>
    %278 = vector.extract_strided_slice %274 {offsets = [0, 96], sizes = [2, 32], strides = [1, 1]} : vector<2x128xf32> to vector<2x32xf32>
    %279 = arith.mulf %276, %258 : vector<2x32xf32>
    %280 = arith.mulf %275, %277 : vector<2x32xf32>
    %281 = arith.addf %279, %280 : vector<2x32xf32>
    %282 = math.tanh %281 : vector<2x32xf32>
    %283 = arith.mulf %278, %282 : vector<2x32xf32>
    %c4_83 = arith.constant 4 : index
    %c0_84 = arith.constant 0 : index
    %284 = vector.load %arg12[%c4_83, %c0_84] : memref<16x32xf32, #tpu.memory_space<vmem>>, vector<2x32xf32>
    tpu.vector_store %arg12[%c4_83, %c0_84], %283 {strides = array<i32>} : memref<16x32xf32, #tpu.memory_space<vmem>>, vector<2x32xf32>,
    %285 = vector.extract_strided_slice %212 {offsets = [6, 0], sizes = [2, 128], strides = [1, 1]} : vector<16x128xf32> to vector<2x128xf32>
    %286 = arith.truncf %283 : vector<2x32xf32> to vector<2x32xbf16>
    %cst_85 = arith.constant dense<0.000000e+00> : vector<2x128xf32>
    %287 = tpu.matmul %286, %213, %cst_85 {dimension_numbers = #tpu.dot_dimension_numbers<[1], [0], [0], [1], [0, 0, 1, 1], [], []>} : vector<2x32xbf16>, vector<32x128xbf16>, vector<2x128xf32> -> vector<2x128xf32>
    %288 = arith.addf %285, %287 : vector<2x128xf32>
    %cst_86 = arith.constant 5.000000e-01 : f32
    %289 = vector.broadcast %cst_86 : f32 to vector<2x128xf32>
    %290 = arith.mulf %288, %289 : vector<2x128xf32>
    %291 = arith.select %5, %288, %290 : vector<2x128xi1>, vector<2x128xf32>
    %292 = math.tanh %291 : vector<2x128xf32>
    %cst_87 = arith.constant 5.000000e-01 : f32
    %293 = vector.broadcast %cst_87 : f32 to vector<2x128xf32>
    %294 = arith.mulf %292, %293 : vector<2x128xf32>
    %cst_88 = arith.constant 5.000000e-01 : f32
    %295 = vector.broadcast %cst_88 : f32 to vector<2x128xf32>
    %296 = arith.addf %294, %295 : vector<2x128xf32>
    %297 = arith.select %5, %292, %296 : vector<2x128xi1>, vector<2x128xf32>
    %298 = vector.extract_strided_slice %297 {offsets = [0, 0], sizes = [2, 32], strides = [1, 1]} : vector<2x128xf32> to vector<2x32xf32>
    %299 = vector.extract_strided_slice %297 {offsets = [0, 32], sizes = [2, 32], strides = [1, 1]} : vector<2x128xf32> to vector<2x32xf32>
    %300 = vector.extract_strided_slice %297 {offsets = [0, 64], sizes = [2, 32], strides = [1, 1]} : vector<2x128xf32> to vector<2x32xf32>
    %301 = vector.extract_strided_slice %297 {offsets = [0, 96], sizes = [2, 32], strides = [1, 1]} : vector<2x128xf32> to vector<2x32xf32>
    %302 = arith.mulf %299, %281 : vector<2x32xf32>
    %303 = arith.mulf %298, %300 : vector<2x32xf32>
    %304 = arith.addf %302, %303 : vector<2x32xf32>
    %305 = math.tanh %304 : vector<2x32xf32>
    %306 = arith.mulf %301, %305 : vector<2x32xf32>
    %c6_89 = arith.constant 6 : index
    %c0_90 = arith.constant 0 : index
    %307 = vector.load %arg12[%c6_89, %c0_90] : memref<16x32xf32, #tpu.memory_space<vmem>>, vector<2x32xf32>
    tpu.vector_store %arg12[%c6_89, %c0_90], %306 {strides = array<i32>} : memref<16x32xf32, #tpu.memory_space<vmem>>, vector<2x32xf32>,
    %308 = vector.extract_strided_slice %212 {offsets = [8, 0], sizes = [2, 128], strides = [1, 1]} : vector<16x128xf32> to vector<2x128xf32>
    %309 = arith.truncf %306 : vector<2x32xf32> to vector<2x32xbf16>
    %cst_91 = arith.constant dense<0.000000e+00> : vector<2x128xf32>
    %310 = tpu.matmul %309, %213, %cst_91 {dimension_numbers = #tpu.dot_dimension_numbers<[1], [0], [0], [1], [0, 0, 1, 1], [], []>} : vector<2x32xbf16>, vector<32x128xbf16>, vector<2x128xf32> -> vector<2x128xf32>
    %311 = arith.addf %308, %310 : vector<2x128xf32>
    %cst_92 = arith.constant 5.000000e-01 : f32
    %312 = vector.broadcast %cst_92 : f32 to vector<2x128xf32>
    %313 = arith.mulf %311, %312 : vector<2x128xf32>
    %314 = arith.select %5, %311, %313 : vector<2x128xi1>, vector<2x128xf32>
    %315 = math.tanh %314 : vector<2x128xf32>
    %cst_93 = arith.constant 5.000000e-01 : f32
    %316 = vector.broadcast %cst_93 : f32 to vector<2x128xf32>
    %317 = arith.mulf %315, %316 : vector<2x128xf32>
    %cst_94 = arith.constant 5.000000e-01 : f32
    %318 = vector.broadcast %cst_94 : f32 to vector<2x128xf32>
    %319 = arith.addf %317, %318 : vector<2x128xf32>
    %320 = arith.select %5, %315, %319 : vector<2x128xi1>, vector<2x128xf32>
    %321 = vector.extract_strided_slice %320 {offsets = [0, 0], sizes = [2, 32], strides = [1, 1]} : vector<2x128xf32> to vector<2x32xf32>
    %322 = vector.extract_strided_slice %320 {offsets = [0, 32], sizes = [2, 32], strides = [1, 1]} : vector<2x128xf32> to vector<2x32xf32>
    %323 = vector.extract_strided_slice %320 {offsets = [0, 64], sizes = [2, 32], strides = [1, 1]} : vector<2x128xf32> to vector<2x32xf32>
    %324 = vector.extract_strided_slice %320 {offsets = [0, 96], sizes = [2, 32], strides = [1, 1]} : vector<2x128xf32> to vector<2x32xf32>
    %325 = arith.mulf %322, %304 : vector<2x32xf32>
    %326 = arith.mulf %321, %323 : vector<2x32xf32>
    %327 = arith.addf %325, %326 : vector<2x32xf32>
    %328 = math.tanh %327 : vector<2x32xf32>
    %329 = arith.mulf %324, %328 : vector<2x32xf32>
    %c8_95 = arith.constant 8 : index
    %c0_96 = arith.constant 0 : index
    %330 = vector.load %arg12[%c8_95, %c0_96] : memref<16x32xf32, #tpu.memory_space<vmem>>, vector<2x32xf32>
    tpu.vector_store %arg12[%c8_95, %c0_96], %329 {strides = array<i32>} : memref<16x32xf32, #tpu.memory_space<vmem>>, vector<2x32xf32>,
    %331 = vector.extract_strided_slice %212 {offsets = [10, 0], sizes = [2, 128], strides = [1, 1]} : vector<16x128xf32> to vector<2x128xf32>
    %332 = arith.truncf %329 : vector<2x32xf32> to vector<2x32xbf16>
    %cst_97 = arith.constant dense<0.000000e+00> : vector<2x128xf32>
    %333 = tpu.matmul %332, %213, %cst_97 {dimension_numbers = #tpu.dot_dimension_numbers<[1], [0], [0], [1], [0, 0, 1, 1], [], []>} : vector<2x32xbf16>, vector<32x128xbf16>, vector<2x128xf32> -> vector<2x128xf32>
    %334 = arith.addf %331, %333 : vector<2x128xf32>
    %cst_98 = arith.constant 5.000000e-01 : f32
    %335 = vector.broadcast %cst_98 : f32 to vector<2x128xf32>
    %336 = arith.mulf %334, %335 : vector<2x128xf32>
    %337 = arith.select %5, %334, %336 : vector<2x128xi1>, vector<2x128xf32>
    %338 = math.tanh %337 : vector<2x128xf32>
    %cst_99 = arith.constant 5.000000e-01 : f32
    %339 = vector.broadcast %cst_99 : f32 to vector<2x128xf32>
    %340 = arith.mulf %338, %339 : vector<2x128xf32>
    %cst_100 = arith.constant 5.000000e-01 : f32
    %341 = vector.broadcast %cst_100 : f32 to vector<2x128xf32>
    %342 = arith.addf %340, %341 : vector<2x128xf32>
    %343 = arith.select %5, %338, %342 : vector<2x128xi1>, vector<2x128xf32>
    %344 = vector.extract_strided_slice %343 {offsets = [0, 0], sizes = [2, 32], strides = [1, 1]} : vector<2x128xf32> to vector<2x32xf32>
    %345 = vector.extract_strided_slice %343 {offsets = [0, 32], sizes = [2, 32], strides = [1, 1]} : vector<2x128xf32> to vector<2x32xf32>
    %346 = vector.extract_strided_slice %343 {offsets = [0, 64], sizes = [2, 32], strides = [1, 1]} : vector<2x128xf32> to vector<2x32xf32>
    %347 = vector.extract_strided_slice %343 {offsets = [0, 96], sizes = [2, 32], strides = [1, 1]} : vector<2x128xf32> to vector<2x32xf32>
    %348 = arith.mulf %345, %327 : vector<2x32xf32>
    %349 = arith.mulf %344, %346 : vector<2x32xf32>
    %350 = arith.addf %348, %349 : vector<2x32xf32>
    %351 = math.tanh %350 : vector<2x32xf32>
    %352 = arith.mulf %347, %351 : vector<2x32xf32>
    %c10_101 = arith.constant 10 : index
    %c0_102 = arith.constant 0 : index
    %353 = vector.load %arg12[%c10_101, %c0_102] : memref<16x32xf32, #tpu.memory_space<vmem>>, vector<2x32xf32>
    tpu.vector_store %arg12[%c10_101, %c0_102], %352 {strides = array<i32>} : memref<16x32xf32, #tpu.memory_space<vmem>>, vector<2x32xf32>,
    %354 = vector.extract_strided_slice %212 {offsets = [12, 0], sizes = [2, 128], strides = [1, 1]} : vector<16x128xf32> to vector<2x128xf32>
    %355 = arith.truncf %352 : vector<2x32xf32> to vector<2x32xbf16>
    %cst_103 = arith.constant dense<0.000000e+00> : vector<2x128xf32>
    %356 = tpu.matmul %355, %213, %cst_103 {dimension_numbers = #tpu.dot_dimension_numbers<[1], [0], [0], [1], [0, 0, 1, 1], [], []>} : vector<2x32xbf16>, vector<32x128xbf16>, vector<2x128xf32> -> vector<2x128xf32>
    %357 = arith.addf %354, %356 : vector<2x128xf32>
    %cst_104 = arith.constant 5.000000e-01 : f32
    %358 = vector.broadcast %cst_104 : f32 to vector<2x128xf32>
    %359 = arith.mulf %357, %358 : vector<2x128xf32>
    %360 = arith.select %5, %357, %359 : vector<2x128xi1>, vector<2x128xf32>
    %361 = math.tanh %360 : vector<2x128xf32>
    %cst_105 = arith.constant 5.000000e-01 : f32
    %362 = vector.broadcast %cst_105 : f32 to vector<2x128xf32>
    %363 = arith.mulf %361, %362 : vector<2x128xf32>
    %cst_106 = arith.constant 5.000000e-01 : f32
    %364 = vector.broadcast %cst_106 : f32 to vector<2x128xf32>
    %365 = arith.addf %363, %364 : vector<2x128xf32>
    %366 = arith.select %5, %361, %365 : vector<2x128xi1>, vector<2x128xf32>
    %367 = vector.extract_strided_slice %366 {offsets = [0, 0], sizes = [2, 32], strides = [1, 1]} : vector<2x128xf32> to vector<2x32xf32>
    %368 = vector.extract_strided_slice %366 {offsets = [0, 32], sizes = [2, 32], strides = [1, 1]} : vector<2x128xf32> to vector<2x32xf32>
    %369 = vector.extract_strided_slice %366 {offsets = [0, 64], sizes = [2, 32], strides = [1, 1]} : vector<2x128xf32> to vector<2x32xf32>
    %370 = vector.extract_strided_slice %366 {offsets = [0, 96], sizes = [2, 32], strides = [1, 1]} : vector<2x128xf32> to vector<2x32xf32>
    %371 = arith.mulf %368, %350 : vector<2x32xf32>
    %372 = arith.mulf %367, %369 : vector<2x32xf32>
    %373 = arith.addf %371, %372 : vector<2x32xf32>
    %374 = math.tanh %373 : vector<2x32xf32>
    %375 = arith.mulf %370, %374 : vector<2x32xf32>
    %c12_107 = arith.constant 12 : index
    %c0_108 = arith.constant 0 : index
    %376 = vector.load %arg12[%c12_107, %c0_108] : memref<16x32xf32, #tpu.memory_space<vmem>>, vector<2x32xf32>
    tpu.vector_store %arg12[%c12_107, %c0_108], %375 {strides = array<i32>} : memref<16x32xf32, #tpu.memory_space<vmem>>, vector<2x32xf32>,
    %377 = vector.extract_strided_slice %212 {offsets = [14, 0], sizes = [2, 128], strides = [1, 1]} : vector<16x128xf32> to vector<2x128xf32>
    %378 = arith.truncf %375 : vector<2x32xf32> to vector<2x32xbf16>
    %cst_109 = arith.constant dense<0.000000e+00> : vector<2x128xf32>
    %379 = tpu.matmul %378, %213, %cst_109 {dimension_numbers = #tpu.dot_dimension_numbers<[1], [0], [0], [1], [0, 0, 1, 1], [], []>} : vector<2x32xbf16>, vector<32x128xbf16>, vector<2x128xf32> -> vector<2x128xf32>
    %380 = arith.addf %377, %379 : vector<2x128xf32>
    %cst_110 = arith.constant 5.000000e-01 : f32
    %381 = vector.broadcast %cst_110 : f32 to vector<2x128xf32>
    %382 = arith.mulf %380, %381 : vector<2x128xf32>
    %383 = arith.select %5, %380, %382 : vector<2x128xi1>, vector<2x128xf32>
    %384 = math.tanh %383 : vector<2x128xf32>
    %cst_111 = arith.constant 5.000000e-01 : f32
    %385 = vector.broadcast %cst_111 : f32 to vector<2x128xf32>
    %386 = arith.mulf %384, %385 : vector<2x128xf32>
    %cst_112 = arith.constant 5.000000e-01 : f32
    %387 = vector.broadcast %cst_112 : f32 to vector<2x128xf32>
    %388 = arith.addf %386, %387 : vector<2x128xf32>
    %389 = arith.select %5, %384, %388 : vector<2x128xi1>, vector<2x128xf32>
    %390 = vector.extract_strided_slice %389 {offsets = [0, 0], sizes = [2, 32], strides = [1, 1]} : vector<2x128xf32> to vector<2x32xf32>
    %391 = vector.extract_strided_slice %389 {offsets = [0, 32], sizes = [2, 32], strides = [1, 1]} : vector<2x128xf32> to vector<2x32xf32>
    %392 = vector.extract_strided_slice %389 {offsets = [0, 64], sizes = [2, 32], strides = [1, 1]} : vector<2x128xf32> to vector<2x32xf32>
    %393 = vector.extract_strided_slice %389 {offsets = [0, 96], sizes = [2, 32], strides = [1, 1]} : vector<2x128xf32> to vector<2x32xf32>
    %394 = arith.mulf %391, %373 : vector<2x32xf32>
    %395 = arith.mulf %390, %392 : vector<2x32xf32>
    %396 = arith.addf %394, %395 : vector<2x32xf32>
    %397 = math.tanh %396 : vector<2x32xf32>
    %398 = arith.mulf %393, %397 : vector<2x32xf32>
    %c14_113 = arith.constant 14 : index
    %c0_114 = arith.constant 0 : index
    %399 = vector.load %arg12[%c14_113, %c0_114] : memref<16x32xf32, #tpu.memory_space<vmem>>, vector<2x32xf32>
    tpu.vector_store %arg12[%c14_113, %c0_114], %398 {strides = array<i32>} : memref<16x32xf32, #tpu.memory_space<vmem>>, vector<2x32xf32>,
    %c1 = arith.constant 1 : index
    %c0_115 = arith.constant 0 : index
    %c0_116 = arith.constant 0 : index
    %400 = vector.load %arg10[%c1, %c0_115, %c0_116] : memref<2x2x32xf32, #tpu.memory_space<vmem>>, vector<1x2x32xf32>
    %401 = vector.shape_cast %400 : vector<1x2x32xf32> to vector<2x32xf32>
    %402 = vector.shape_cast %398 : vector<2x32xf32> to vector<1x2x32xf32>
    tpu.vector_store %arg10[%c1, %c0_115, %c0_116], %402 {strides = array<i32>} : memref<2x2x32xf32, #tpu.memory_space<vmem>>, vector<1x2x32xf32>,
    %c1_117 = arith.constant 1 : index
    %c0_118 = arith.constant 0 : index
    %c0_119 = arith.constant 0 : index
    %403 = vector.load %arg11[%c1_117, %c0_118, %c0_119] : memref<2x2x32xf32, #tpu.memory_space<vmem>>, vector<1x2x32xf32>
    %404 = vector.shape_cast %403 : vector<1x2x32xf32> to vector<2x32xf32>
    %405 = vector.shape_cast %396 : vector<2x32xf32> to vector<1x2x32xf32>
    tpu.vector_store %arg11[%c1_117, %c0_118, %c0_119], %405 {strides = array<i32>} : memref<2x2x32xf32, #tpu.memory_space<vmem>>, vector<1x2x32xf32>,
    %c0_120 = arith.constant 0 : index
    %c0_121 = arith.constant 0 : index
    %406 = vector.load %arg12[%c0_120, %c0_121] : memref<16x32xf32, #tpu.memory_space<vmem>>, vector<16x32xf32>
    %407 = arith.truncf %406 : vector<16x32xf32> to vector<16x32xbf16>
    %c0_122 = arith.constant 0 : index
    %c0_123 = arith.constant 0 : index
    %408 = vector.load %arg7[%c0_122, %c0_123] : memref<32x4xbf16, #tpu.memory_space<vmem>>, vector<32x4xbf16>
    %cst_124 = arith.constant dense<0.000000e+00> : vector<16x4xf32>
    %409 = tpu.matmul %407, %408, %cst_124 {dimension_numbers = #tpu.dot_dimension_numbers<[1], [0], [0], [1], [0, 0, 1, 1], [], []>} : vector<16x32xbf16>, vector<32x4xbf16>, vector<16x4xf32> -> vector<16x4xf32>
    %c0_125 = arith.constant 0 : index
    %c0_126 = arith.constant 0 : index
    %410 = vector.load %arg8[%c0_125, %c0_126] : memref<1x4xf32, #tpu.memory_space<vmem>>, vector<1x4xf32>
    %411 = vector.broadcast %410 : vector<1x4xf32> to vector<16x4xf32>
    %412 = arith.addf %409, %411 : vector<16x4xf32>
    %c0_127 = arith.constant 0 : index
    %c0_128 = arith.constant 0 : index
    %413 = vector.load %arg9[%c0_127, %c0_128] : memref<16x4xf32, #tpu.memory_space<vmem>>, vector<16x4xf32>
    tpu.vector_store %arg9[%c0_127, %c0_128], %412 {strides = array<i32>} : memref<16x4xf32, #tpu.memory_space<vmem>>, vector<16x4xf32>,
    return
  }
}

</mosaic_0001>

<bundles_post_ra>
// kernel: tpu_custom_call.1
= control target key start
LH: loop header
LB: loop body
LE: loop exit
PB: predicated region body
PF: predicated region fallthrough
CT: control target
= control target key end

     0   :  { %17 = vsyncpa [#allocation4], 0  ;;  %s1740_s0 = inlined_call_operand.vmem [shape: f32[16,8], index: 0, kind: input, shape index: {}]   ;;  %s1741_s1 = inlined_call_operand.vmem [shape: bf16[8,128], index: 1, kind: input, shape index: {}]   ;;  %s1742_s2 = inlined_call_operand.vmem [shape: bf16[32,128], index: 2, kind: input, shape index: {}]   ;;  %s1743_s3 = inlined_call_operand.vmem [shape: f32[1,128], index: 3, kind: input, shape index: {}]   ;;  %s1744_s4 = inlined_call_operand.vmem [shape: bf16[32,128], index: 4, kind: input, shape index: {}]   ;;  %s1745_s5 = inlined_call_operand.hbm [shape: bf16[32,128], index: 5, kind: input, shape index: {}]   ;;  %s1746_s6 = inlined_call_operand.vmem [shape: f32[1,128], index: 6, kind: input, shape index: {}]   ;;  %s1747_s7 = inlined_call_operand.vmem [shape: bf16[32,4], index: 7, kind: input, shape index: {}]   ;;  %s1748_s8 = inlined_call_operand.vmem [shape: f32[1,4], index: 8, kind: input, shape index: {}]   ;;  %s1749_s9 = inlined_call_operand.vmem [shape: f32[16,4], index: 9, kind: output, shape index: {0}]   ;;  %s1750_s10 = inlined_call_operand.hbm [shape: f32[2,2,32], index: 10, kind: output, shape index: {1}]   ;;  %s1751_s11 = inlined_call_operand.hbm [shape: f32[2,2,32], index: 11, kind: output, shape index: {2}]  }
   0x1   :  { %18 = vsyncpa [#allocation5], 0 }
   0x2   :  { %19 = vsyncpa [#allocation8], 0  ;;  %s34_s19 = sshll.u32 %s1745_s5, 4  ;;  %s1334_s20 = smov [#allocation3]   ;;  %s35_s19 = int_to_ptr.hbm [resolvable:$true] %s34_s19 }
   0x3   :  { %s36_s21 = sshll.u32 %s1334_s20, 4  ;;  %s1335_s22 = smov 64   ;;  %s37_s21 = int_to_ptr.vmem [resolvable:$true] %s36_s21 }
   0x4   :  { %s1336_s23 = smov 4  }
   0x5   :  { %42 = dma.hbm_to_vmem [thread:$0]  %s35_s19, 256, %s37_s21, [#allocation4], %s1335_s22, %s1335_s22, %s1336_s23  }
   0x6   :  { %1328 = dma.done.wait [#allocation4], 256  }
   0x7   :  { %1329 = vsyncadd [#allocation4], 4294967040  ;;  %vm71_vm0 = vcmask 1043456   ;;  %v62_v0 = vld [vmem:[%s1741_s1] sm:$0xf]  ;;  %v1173_v1 = vld [vmem:[%s1742_s2 + $0x8] sm:$0xff]  ;;  %v54_v8 = vlaneseq }
   0x8   :  { %v59_v2 = vld [vmem:[%s1740_s0] sm:$0xff]  ;;  %v73_v3 = vsel %vm71_vm0, %v62_v0, 0  ;;  %v60_v4 = vld [vmem:[%s1740_s0 + $0x8] sm:$0xff]  ;;  %115 = vmatpush.bf16.msra.mxu1 %v1173_v1  ;;  %vm67_vm1 = vcmask 64512   ;;  %164 = vmatpush.bf16.msra.mxu2 %v1173_v1  ;;  %v1337_v7 = vmov 0   ;;  %vm105_vm5 = vcmask 261120  }
   0x9   :  { %82 = vmatpush.bf16.msra.mxu0 %v73_v3  ;;  %v61_v5 = vpack.c.bf16 %v60_v4, %v59_v2  ;;  %v1172_v6 = vld [vmem:[%s1742_s2] sm:$0xff]  ;;  %221 = vmatpush.bf16.msra.mxu3 %v1173_v1  ;;  %v55_v10 = vand.u32 127, %v54_v8  ;;  %s1338_s2 = smov 32   ;;  %vm149_vm6 = vcmask 254976   ;;  %vm319_vm7 = vcmask 261126   ;;  %s1090_s26 = sshll.u32 %s1750_s10, 4  ;;  %s1091_s26 = int_to_ptr.hbm [resolvable:$true] %s1090_s26 }
   0xa   :  { %v1427_v9 = vld [vmem:[%s1743_s3] ss:$0 sm:$0xff]  ;;  %vm262_vm8 = vcmask 259076   ;;  %vm205_vm9 = vcmask 257026   ;;  %s1342_s5 = smov 2   ;;  %s1103_s30 = sshll.u32 %s1751_s11, 4  ;;  %s1104_s30 = int_to_ptr.hbm [resolvable:$true] %s1103_s30 }
   0xb   :  { %vm56_vm2 = vcmp.ge.s32.totalorder %v55_v10, 64  ;;  %vm57_vm3 = vcmp.lt.s32.totalorder %v55_v10, 96  ;;  %vm1079_vm10 = vcmask 31744  }
   0xc   :  { %1123 = vmatmul.msk.bf16.vlgmr.msra.gmra.mxu0 %vm67_vm1, %v61_v5  ;;  %116 = vmatpush.bf16.msra.mxu1 %v1172_v6  ;;  %vm1433_vm4 = vmand %vm56_vm2, %vm57_vm3 }
   0xd   :  { %278 = vmatpush.bf16.msrb.mxu0 %v1173_v1  ;;  %165 = vmatpush.bf16.msra.mxu2 %v1172_v6 }
   0xe   :  { %222 = vmatpush.bf16.msra.mxu3 %v1172_v6 }
   0xf   :  { %117 = vmatmul.bf16.vlgmr.msra.gmra.mxu1 %v1337_v7 }
  0x10   :  { %335 = vmatpush.bf16.msrb.mxu1 %v1173_v1 }
  0x11   :  { %279 = vmatpush.bf16.msrb.mxu0 %v1172_v6  ;;  %387 = vmatpush.bf16.msrb.mxu2 %v1173_v1 }
  0x12   :  { %443 = vmatpush.bf16.msrb.mxu3 %v1173_v1 }
  0x14   :  { %336 = vmatpush.bf16.msrb.mxu1 %v1172_v6 }
  0x15   :  { %499 = vmatpush.bf16.msra.mxu0 %v1173_v1  ;;  %388 = vmatpush.bf16.msrb.mxu2 %v1172_v6 }
  0x16   :  { %444 = vmatpush.bf16.msrb.mxu3 %v1172_v6 }
  0x19   :  { %500 = vmatpush.bf16.msra.mxu0 %v1172_v6 }
  0x89   :  { %v84_v11 = vpop.f32.mrf.mxu0 }
  0x8a   :  { %v1430_v12 = vadd.f32 %v1427_v9, %v84_v11 }
  0x8c   :  { %v118_v13 = vpop.f32.mrf.mxu1 }
  0x8d   :  { %v122_v14 = vadd.f32 %v118_v13, %v1430_v12 }
  0x8f   :  { %v123_v16 = vmul.f32 0.5, %v122_v14 }
  0x91   :  { %v124_v17 = vsel %vm1433_vm4, %v122_v14, %v123_v16  ;;  %v86_v16 = vpop.f32.mrf.mxu0 }
  0x92   :  { %1192 = vtanh.f32 %v124_v17 }
  0x94   :  { %v120_v18 = vpop.f32.mrf.mxu1 }
  0x98   :  { %v1193_v19 = vpop.eup %1192 }
  0x99   :  { %v126_v20 = vmul.f32 0.5, %v1193_v19 }
  0x9b   :  { %v127_v21 = vadd.f32 0.5, %v126_v20 }
  0x9d   :  { %v128_v22 = vsel %vm1433_vm4, %v1193_v19, %v127_v21 }
  0x9e   :  { %130 = vrot.lane.b32.xlu0 %v128_v22, %s1335_s22 }
 0x110   :  { %v131_v23 = vpop.permute.xlu0 %130 }
 0x111   :  { %v133_v24 = vmul.f32 %v131_v23, %v128_v22 }
 0x113   :  { %135 = vrot.lane.b32.xlu0 %v133_v24, %s1338_s2 }
 0x185   :  { %v136_v25 = vpop.permute.xlu0 %135 }
 0x186   :  { %v138_v26 = vadd.f32 %v136_v25, %v128_v22 }
 0x188   :  { %1194 = vtanh.f32 %v138_v26  ;;  %v182_v44 = vrot.slane %v138_v26, 6 }
 0x18e   :  { %v1195_v27 = vpop.eup %1194 }
 0x18f   :  { %141 = vrot.lane.b32.xlu1 %v1195_v27, %s1335_s22 }
 0x201   :  { %v142_v28 = vpop.permute.xlu1 %141 }
 0x202   :  { %v1444_v29 = vmul.f32 %v142_v28, %v128_v22 }
 0x204   :  { %v151_v30 = vpack.c.bf16 %v1444_v29, %v1444_v29 }
 0x206   :  { %153 = vrot.lane.b32.xlu1 %v151_v30, %s1338_s2 }
 0x278   :  { %v154_v31 = vpop.permute.xlu1 %153 }
 0x279   :  { %1132 = vmatmul.msk.bf16.vlgmr.msra.gmra.mxu2 %vm105_vm5, %v154_v31 }
 0x2fc   :  { %v167_v32 = vpop.f32.mrf.mxu2 }
 0x2fd   :  { %v172_v33 = vrot.slane %v167_v32, 6 }
 0x2ff   :  { %v174_v34 = vadd.f32 %v172_v33, %v1430_v12 }
 0x301   :  { %v175_v35 = vmul.f32 0.5, %v174_v34 }
 0x303   :  { %v176_v36 = vsel %vm1433_vm4, %v174_v34, %v175_v35 }
 0x304   :  { %1196 = vtanh.f32 %v176_v36  ;;  %v169_v37 = vpop.f32.mrf.mxu2 }
 0x30a   :  { %v1197_v38 = vpop.eup %1196 }
 0x30b   :  { %v178_v39 = vmul.f32 0.5, %v1197_v38 }
 0x30d   :  { %v179_v40 = vadd.f32 0.5, %v178_v39  ;;  %v1493_v39 = vadd.f32 %v1427_v9, %v86_v16 }
 0x30f   :  { %v180_v41 = vsel %vm1433_vm4, %v1197_v38, %v179_v40 }
 0x310   :  { %186 = vrot.lane.b32.xlu2 %v180_v41, %s1335_s22  ;;  %v184_v45 = vmul.f32 %v182_v44, %v180_v41 }
 0x36a   :  { %v187_v42 = vpop.permute.xlu2 %186 }
 0x36b   :  { %v189_v43 = vmul.f32 %v187_v42, %v180_v41 }
 0x36d   :  { %191 = vrot.lane.b32.xlu2 %v189_v43, %s1338_s2 }
 0x3c7   :  { %v192_v46 = vpop.permute.xlu2 %191 }
 0x3c8   :  { %v194_v47 = vadd.f32 %v192_v46, %v184_v45 }
 0x3ca   :  { %1198 = vtanh.f32 %v194_v47  ;;  %v239_v2 = vrot.slane %v194_v47, 6 }
 0x3d0   :  { %v1199_v48 = vpop.eup %1198 }
 0x3d1   :  { %197 = vrot.lane.b32.xlu0 %v1199_v48, %s1335_s22 }
 0x443   :  { %v198_v49 = vpop.permute.xlu0 %197 }
 0x444   :  { %v1458_v50 = vmul.f32 %v198_v49, %v180_v41 }
 0x446   :  { %v207_v51 = vpack.c.bf16 %v1458_v50, %v1458_v50 }
 0x448   :  { %v209_v52 = vrot.slane %v207_v51, 1 }
 0x44a   :  { %210 = vrot.lane.b32.xlu1 %v209_v52, %s1338_s2 }
 0x4bc   :  { %v211_v53 = vpop.permute.xlu1 %210 }
 0x4bd   :  { %1133 = vmatmul.msk.bf16.vlgmr.msra.gmra.mxu3 %vm105_vm5, %v211_v53 }
 0x540   :  { %v224_v54 = vpop.f32.mrf.mxu3 }
 0x541   :  { %v229_v55 = vrot.slane %v224_v54, 4 }
 0x543   :  { %v231_v56 = vadd.f32 %v229_v55, %v1430_v12 }
 0x545   :  { %v232_v57 = vmul.f32 0.5, %v231_v56 }
 0x547   :  { %v233_v58 = vsel %vm1433_vm4, %v231_v56, %v232_v57 }
 0x548   :  { %1200 = vtanh.f32 %v233_v58  ;;  %v226_v59 = vpop.f32.mrf.mxu3 }
 0x54e   :  { %v1201_v60 = vpop.eup %1200 }
 0x54f   :  { %v235_v61 = vmul.f32 0.5, %v1201_v60 }
 0x551   :  { %v236_v62 = vadd.f32 0.5, %v235_v61 }
 0x553   :  { %v237_v63 = vsel %vm1433_vm4, %v1201_v60, %v236_v62 }
 0x554   :  { %243 = vrot.lane.b32.xlu2 %v237_v63, %s1335_s22  ;;  %v241_v3 = vmul.f32 %v239_v2, %v237_v63 }
 0x5ae   :  { %v244_v0 = vpop.permute.xlu2 %243 }
 0x5af   :  { %v246_v1 = vmul.f32 %v244_v0, %v237_v63 }
 0x5b1   :  { %248 = vrot.lane.b32.xlu0 %v246_v1, %s1338_s2 }
 0x623   :  { %v249_v4 = vpop.permute.xlu0 %248 }
 0x624   :  { %v251_v5 = vadd.f32 %v249_v4, %v241_v3 }
 0x626   :  { %1202 = vtanh.f32 %v251_v5  ;;  %v296_v30 = vrot.slane %v251_v5, 6 }
 0x62c   :  { %v1203_v6 = vpop.eup %1202 }
 0x62d   :  { %254 = vrot.lane.b32.xlu1 %v1203_v6, %s1335_s22 }
 0x69f   :  { %v255_v8 = vpop.permute.xlu1 %254 }
 0x6a0   :  { %v1472_v10 = vmul.f32 %v255_v8, %v237_v63 }
 0x6a2   :  { %v264_v11 = vpack.c.bf16 %v1472_v10, %v1472_v10 }
 0x6a4   :  { %v266_v13 = vrot.slane %v264_v11, 2 }
 0x6a6   :  { %267 = vrot.lane.b32.xlu2 %v266_v13, %s1338_s2 }
 0x700   :  { %v268_v14 = vpop.permute.xlu2 %267 }
 0x701   :  { %1134 = vmatmul.msk.bf16.vlgmr.msrb.gmra.mxu0 %vm105_vm5, %v268_v14 }
 0x77e   :  { %v281_v17 = vpop.f32.mrf.mxu0 }
 0x77f   :  { %v286_v18 = vrot.slane %v281_v17, 2 }
 0x781   :  { %v288_v19 = vadd.f32 %v286_v18, %v1430_v12 }
 0x783   :  { %v289_v20 = vmul.f32 0.5, %v288_v19 }
 0x785   :  { %v290_v21 = vsel %vm1433_vm4, %v288_v19, %v289_v20 }
 0x786   :  { %1204 = vtanh.f32 %v290_v21  ;;  %v283_v22 = vpop.f32.mrf.mxu0 }
 0x78c   :  { %v1205_v23 = vpop.eup %1204 }
 0x78d   :  { %v292_v24 = vmul.f32 0.5, %v1205_v23 }
 0x78f   :  { %v293_v25 = vadd.f32 0.5, %v292_v24 }
 0x791   :  { %v294_v26 = vsel %vm1433_vm4, %v1205_v23, %v293_v25 }
 0x792   :  { %300 = vrot.lane.b32.xlu0 %v294_v26, %s1335_s22  ;;  %v298_v12 = vmul.f32 %v296_v30, %v294_v26 }
 0x804   :  { %v301_v27 = vpop.permute.xlu0 %300 }
 0x805   :  { %v303_v28 = vmul.f32 %v301_v27, %v294_v26 }
 0x807   :  { %305 = vrot.lane.b32.xlu1 %v303_v28, %s1338_s2 }
 0x879   :  { %v306_v31 = vpop.permute.xlu1 %305 }
 0x87a   :  { %v308_v32 = vadd.f32 %v306_v31, %v298_v12 }
 0x87c   :  { %1206 = vtanh.f32 %v308_v32  ;;  %v350_v51 = vrot.slane %v308_v32, 6 }
 0x882   :  { %v1207_v33 = vpop.eup %1206 }
 0x883   :  { %311 = vrot.lane.b32.xlu2 %v1207_v33, %s1335_s22 }
 0x8dd   :  { %v312_v34 = vpop.permute.xlu2 %311 }
 0x8de   :  { %v1486_v35 = vmul.f32 %v312_v34, %v294_v26 }
 0x8e0   :  { %v321_v36 = vpack.c.bf16 %v1486_v35, %v1486_v35 }
 0x8e2   :  { %v323_v37 = vrot.slane %v321_v36, 3 }
 0x8e4   :  { %324 = vrot.lane.b32.xlu0 %v323_v37, %s1338_s2 }
 0x956   :  { %v325_v38 = vpop.permute.xlu0 %324 }
 0x957   :  { %1135 = vmatmul.msk.bf16.vlgmr.msrb.gmra.mxu1 %vm105_vm5, %v325_v38 }
 0x9d4   :  { %v338_v40 = vpop.f32.mrf.mxu1 }
 0x9d5   :  { %v342_v41 = vadd.f32 %v338_v40, %v1493_v39 }
 0x9d7   :  { %v343_v42 = vmul.f32 0.5, %v342_v41 }
 0x9d9   :  { %v344_v43 = vsel %vm1433_vm4, %v342_v41, %v343_v42 }
 0x9da   :  { %1208 = vtanh.f32 %v344_v43 }
 0x9dc   :  { %v340_v44 = vpop.f32.mrf.mxu1 }
 0x9e0   :  { %v1209_v45 = vpop.eup %1208 }
 0x9e1   :  { %v346_v46 = vmul.f32 0.5, %v1209_v45 }
 0x9e3   :  { %v347_v47 = vadd.f32 0.5, %v346_v46 }
 0x9e5   :  { %v348_v48 = vsel %vm1433_vm4, %v1209_v45, %v347_v47 }
 0x9e6   :  { %354 = vrot.lane.b32.xlu1 %v348_v48, %s1335_s22  ;;  %v352_v52 = vmul.f32 %v350_v51, %v348_v48 }
 0xa58   :  { %v355_v49 = vpop.permute.xlu1 %354 }
 0xa59   :  { %v357_v9 = vmul.f32 %v355_v49, %v348_v48 }
 0xa5b   :  { %359 = vrot.lane.b32.xlu2 %v357_v9, %s1338_s2 }
 0xab5   :  { %v360_v53 = vpop.permute.xlu2 %359 }
 0xab6   :  { %v362_v54 = vadd.f32 %v360_v53, %v352_v52 }
 0xab8   :  { %1210 = vtanh.f32 %v362_v54  ;;  %v405_v11 = vrot.slane %v362_v54, 6 }
 0xabe   :  { %v1211_v55 = vpop.eup %1210 }
 0xabf   :  { %365 = vrot.lane.b32.xlu0 %v1211_v55, %s1335_s22 }
 0xb31   :  { %v366_v56 = vpop.permute.xlu0 %365 }
 0xb32   :  { %v1503_v57 = vmul.f32 %v366_v56, %v348_v48 }
 0xb34   :  { %v374_v58 = vpack.c.bf16 %v1503_v57, %v1503_v57 }
 0xb36   :  { %376 = vrot.lane.b32.xlu1 %v374_v58, %s1338_s2 }
 0xba8   :  { %v377_v59 = vpop.permute.xlu1 %376 }
 0xba9   :  { %1136 = vmatmul.msk.bf16.vlgmr.msrb.gmra.mxu2 %vm105_vm5, %v377_v59 }
 0xc2c   :  { %v390_v60 = vpop.f32.mrf.mxu2 }
 0xc2d   :  { %v395_v61 = vrot.slane %v390_v60, 6 }
 0xc2f   :  { %v397_v62 = vadd.f32 %v395_v61, %v1493_v39 }
 0xc31   :  { %v398_v63 = vmul.f32 0.5, %v397_v62 }
 0xc33   :  { %v399_v0 = vsel %vm1433_vm4, %v397_v62, %v398_v63 }
 0xc34   :  { %1212 = vtanh.f32 %v399_v0  ;;  %v392_v1 = vpop.f32.mrf.mxu2 }
 0xc3a   :  { %v1213_v2 = vpop.eup %1212 }
 0xc3b   :  { %v401_v3 = vmul.f32 0.5, %v1213_v2 }
 0xc3d   :  { %v402_v4 = vadd.f32 0.5, %v401_v3  ;;  %v1176_v3 = vld [vmem:[#allocation3] sm:$0xff] }
 0xc3f   :  { %v403_v5 = vsel %vm1433_vm4, %v1213_v2, %v402_v4  ;;  %v1175_v2 = vld [vmem:[%s1744_s4 + $0x8] sm:$0xff] }
 0xc40   :  { %409 = vrot.lane.b32.xlu2 %v403_v5, %s1335_s22  ;;  %v407_v13 = vmul.f32 %v405_v11, %v403_v5  ;;  %579 = vmatpush.bf16.msra.mxu1 %v1175_v2 }
 0xc9a   :  { %v410_v6 = vpop.permute.xlu2 %409 }
 0xc9b   :  { %v412_v8 = vmul.f32 %v410_v6, %v403_v5 }
 0xc9d   :  { %414 = vrot.lane.b32.xlu0 %v412_v8, %s1338_s2  ;;  %v1174_v8 = vld [vmem:[%s1744_s4] sm:$0xff]  ;;  %s1339_s4 = smov 96  }
 0xc9e   :  { %580 = vmatpush.bf16.msra.mxu1 %v1174_v8 }
 0xd0f   :  { %v415_v14 = vpop.permute.xlu0 %414 }
 0xd10   :  { %v417_v16 = vadd.f32 %v415_v14, %v407_v13 }
 0xd12   :  { %1214 = vtanh.f32 %v417_v16  ;;  %v461_v36 = vrot.slane %v417_v16, 6 }
 0xd18   :  { %v1215_v17 = vpop.eup %1214 }
 0xd19   :  { %420 = vrot.lane.b32.xlu1 %v1215_v17, %s1335_s22 }
 0xd8b   :  { %v421_v18 = vpop.permute.xlu1 %420 }
 0xd8c   :  { %v1517_v19 = vmul.f32 %v421_v18, %v403_v5  ;;  %v1578_v18 = vld [vmem:[%s1746_s6] ss:$0 sm:$0xff] }
 0xd8e   :  { %v429_v20 = vpack.c.bf16 %v1517_v19, %v1517_v19 }
 0xd90   :  { %v431_v21 = vrot.slane %v429_v20, 1 }
 0xd92   :  { %432 = vrot.lane.b32.xlu2 %v431_v21, %s1338_s2 }
 0xdec   :  { %v433_v22 = vpop.permute.xlu2 %432 }
 0xded   :  { %1137 = vmatmul.msk.bf16.vlgmr.msrb.gmra.mxu3 %vm105_vm5, %v433_v22 }
 0xe70   :  { %v446_v23 = vpop.f32.mrf.mxu3 }
 0xe71   :  { %v451_v24 = vrot.slane %v446_v23, 4 }
 0xe73   :  { %v453_v25 = vadd.f32 %v451_v24, %v1493_v39 }
 0xe75   :  { %v454_v26 = vmul.f32 0.5, %v453_v25 }
 0xe77   :  { %v455_v27 = vsel %vm1433_vm4, %v453_v25, %v454_v26 }
 0xe78   :  { %1216 = vtanh.f32 %v455_v27  ;;  %v448_v28 = vpop.f32.mrf.mxu3 }
 0xe7e   :  { %v1217_v30 = vpop.eup %1216 }
 0xe7f   :  { %v457_v12 = vmul.f32 0.5, %v1217_v30 }
 0xe81   :  { %v458_v31 = vadd.f32 0.5, %v457_v12 }
 0xe83   :  { %v459_v32 = vsel %vm1433_vm4, %v1217_v30, %v458_v31 }
 0xe84   :  { %465 = vrot.lane.b32.xlu0 %v459_v32, %s1335_s22  ;;  %v463_v37 = vmul.f32 %v461_v36, %v459_v32 }
 0xef6   :  { %v466_v33 = vpop.permute.xlu0 %465 }
 0xef7   :  { %v468_v34 = vmul.f32 %v466_v33, %v459_v32 }
 0xef9   :  { %470 = vrot.lane.b32.xlu1 %v468_v34, %s1338_s2 }
 0xf6b   :  { %v471_v38 = vpop.permute.xlu1 %470 }
 0xf6c   :  { %v473_v40 = vadd.f32 %v471_v38, %v463_v37 }
 0xf6e   :  { %1218 = vtanh.f32 %v473_v40 }
 0xf74   :  { %v1219_v41 = vpop.eup %1218 }
 0xf75   :  { %476 = vrot.lane.b32.xlu2 %v1219_v41, %s1335_s22 }
 0xfcf   :  { %v477_v42 = vpop.permute.xlu2 %476 }
 0xfd0   :  { %v479_v43 = vmul.f32 %v477_v42, %v459_v32 }
 0xfd2   :  { %v485_v44 = vpack.c.bf16 %v479_v43, %v479_v43 }
 0xfd4   :  { %v487_v45 = vrot.slane %v485_v44, 2 }
 0xfd6   :  { %488 = vrot.lane.b32.xlu0 %v487_v45, %s1338_s2 }
0x1048   :  { %v489_v46 = vpop.permute.xlu0 %488 }
0x1049   :  { %1138 = vmatmul.msk.bf16.vlgmr.msra.gmra.mxu0 %vm105_vm5, %v489_v46 }
0x10c6   :  { %v502_v47 = vpop.f32.mrf.mxu0 }
0x10c7   :  { %v507_v48 = vrot.slane %v502_v47, 2 }
0x10c9   :  { %v509_v49 = vadd.f32 %v507_v48, %v1493_v39 }
0x10cb   :  { %v510_v9 = vmul.f32 0.5, %v509_v49 }
0x10cd   :  { %v511_v51 = vsel %vm1433_vm4, %v509_v49, %v510_v9 }
0x10ce   :  { %1220 = vtanh.f32 %v511_v51  ;;  %v504_v52 = vpop.f32.mrf.mxu0 }
0x10d4   :  { %v1221_v53 = vpop.eup %1220 }
0x10d5   :  { %v513_v54 = vmul.f32 0.5, %v1221_v53 }
0x10d7   :  { %v514_v55 = vadd.f32 0.5, %v513_v54 }
0x10d9   :  { %v515_v56 = vsel %vm1433_vm4, %v1221_v53, %v514_v55 }
0x10da   :  { %521 = vrot.lane.b32.xlu1 %v515_v56, %s1335_s22 }
0x10e2   :  { %146 = vrot.lane.b32.xlu1 %v1444_v29, %s1338_s2 }
0x10ea   :  { %316 = vrot.lane.b32.xlu1 %v1486_v35, %s1338_s2  ;;  %v517_v35 = vrot.slane %v473_v40, 6 }
0x10ec   :  { %v519_v61 = vmul.f32 %v517_v35, %v515_v56 }
0x10f2   :  { %481 = vrot.lane.b32.xlu1 %v479_v43, %s1338_s2 }
0x114c   :  { %v522_v39 = vpop.permute.xlu1 %521 }
0x114d   :  { %v524_v58 = vmul.f32 %v522_v39, %v515_v56 }
0x114f   :  { %526 = vrot.lane.b32.xlu2 %v524_v58, %s1338_s2 }
0x1154   :  { %v147_v59 = vpop.permute.xlu1 %146 }
0x1155   :  { %150 = vst.msk [vmem:[#allocation2] sm:$0x3] %vm149_vm6, %v147_v59 }
0x1157   :  { %202 = vrot.lane.b32.xlu2 %v1458_v50, %s1338_s2 }
0x115c   :  { %v317_v60 = vpop.permute.xlu1 %316 }
0x115d   :  { %320 = vst.msk [vmem:[#allocation2] sm:$0xc0] %vm319_vm7, %v317_v60 }
0x115f   :  { %370 = vrot.lane.b32.xlu2 %v1503_v57, %s1338_s2  ;;  %v1177_v57 = vld [vmem:[#allocation3 + $0x8] sm:$0xff] }
0x1160   :  { %609 = vmatpush.bf16.msra.mxu2 %v1177_v57  ;;  %657 = vmatpush.bf16.msra.mxu3 %v1177_v57 }
0x1161   :  { %713 = vmatpush.bf16.msrb.mxu0 %v1177_v57  ;;  %769 = vmatpush.bf16.msrb.mxu1 %v1177_v57 }
0x1164   :  { %v482_v29 = vpop.permute.xlu1 %481  ;;  %610 = vmatpush.bf16.msra.mxu2 %v1176_v3  ;;  %658 = vmatpush.bf16.msra.mxu3 %v1176_v3 }
0x1165   :  { %484 = vst.msk [vmem:[#allocation2 + $0x8] sm:$0x30] %vm262_vm8, %v482_v29  ;;  %714 = vmatpush.bf16.msrb.mxu0 %v1176_v3  ;;  %770 = vmatpush.bf16.msrb.mxu1 %v1176_v3 }
0x1167   :  { %611 = vmatmul.bf16.vlgmr.msra.gmra.mxu2 %v1337_v7 }
0x1168   :  { %825 = vmatpush.bf16.msrb.mxu2 %v1177_v57  ;;  %877 = vmatpush.bf16.msrb.mxu3 %v1177_v57 }
0x1169   :  { %933 = vmatpush.bf16.msra.mxu0 %v1177_v57 }
0x116c   :  { %826 = vmatpush.bf16.msrb.mxu2 %v1176_v3  ;;  %878 = vmatpush.bf16.msrb.mxu3 %v1176_v3 }
0x116d   :  { %934 = vmatpush.bf16.msra.mxu0 %v1176_v3 }
0x11a9   :  { %v527_v62 = vpop.permute.xlu2 %526 }
0x11aa   :  { %v1552_v63 = vadd.f32 %v527_v62, %v519_v61 }
0x11ac   :  { %1222 = vtanh.f32 %v1552_v63 }
0x11b1   :  { %v203_v50 = vpop.permute.xlu2 %202 }
0x11b2   :  { %v1223_v0 = vpop.eup %1222  ;;  %206 = vst.msk [vmem:[#allocation2] sm:$0xc] %vm205_vm9, %v203_v50 }
0x11b3   :  { %532 = vrot.lane.b32.xlu0 %v1223_v0, %s1335_s22 }
0x11b9   :  { %v371_v1 = vpop.permute.xlu2 %370 }
0x11ba   :  { %373 = vst.msk [vmem:[#allocation2 + $0x8] sm:$0x3] %vm149_vm6, %v371_v1 }
0x11bb   :  { %259 = vrot.lane.b32.xlu0 %v1472_v10, %s1338_s2 }
0x11c3   :  { %425 = vrot.lane.b32.xlu0 %v1517_v19, %s1338_s2 }
0x11ea   :  { %v612_v16 = vpop.f32.mrf.mxu2 }
0x11f2   :  { %v614_v17 = vpop.f32.mrf.mxu2 }
0x1225   :  { %v533_v10 = vpop.permute.xlu0 %532 }
0x1226   :  { %v535_v4 = vmul.f32 %v533_v10, %v515_v56 }
0x1228   :  { %537 = vrot.lane.b32.xlu2 %v535_v4, %s1338_s2 }
0x122d   :  { %v260_v5 = vpop.permute.xlu0 %259 }
0x122e   :  { %263 = vst.msk [vmem:[#allocation2] sm:$0x30] %vm262_vm8, %v260_v5 }
0x1235   :  { %v426_v6 = vpop.permute.xlu0 %425  ;;  %v547_v11 = vld [vmem:[#allocation2] sm:$0xff] }
0x1236   :  { %428 = vst.msk [vmem:[#allocation2 + $0x8] sm:$0xc] %vm205_vm9, %v426_v6 }
0x1282   :  { %v538_v7 = vpop.permute.xlu2 %537 }
0x1283   :  { %540 = vst.msk [vmem:[#allocation2 + $0x8] sm:$0xc0] %vm319_vm7, %v538_v7 }
0x1284   :  { %541 = vst.msk [vmem:[#allocation6 - $0x6] sm:$0xc0] %vm319_vm7, %v538_v7 }
0x128a   :  { %v548_v13 = vld [vmem:[#allocation2 + $0x8] sm:$0xff] }
0x128b   :  { %v549_v14 = vpack.c.bf16 %v548_v13, %v547_v11 }
0x128d   :  { %1147 = vmatmul.msk.bf16.vlgmr.msra.gmra.mxu1 %vm105_vm5, %v549_v14 }
0x128e   :  { %989 = vmatpush.bf16.msra.mxu1 %v1177_v57 }
0x1292   :  { %990 = vmatpush.bf16.msra.mxu1 %v1176_v3 }
0x130a   :  { %v582_v19 = vpop.f32.mrf.mxu1 }
0x130b   :  { %v1581_v20 = vadd.f32 %v1578_v18, %v582_v19 }
0x130d   :  { %v616_v21 = vadd.f32 %v612_v16, %v1581_v20 }
0x130f   :  { %v617_v22 = vmul.f32 0.5, %v616_v21 }
0x1311   :  { %v618_v23 = vsel %vm1433_vm4, %v616_v21, %v617_v22 }
0x1312   :  { %1224 = vtanh.f32 %v618_v23  ;;  %v584_v21 = vpop.f32.mrf.mxu1 }
0x1318   :  { %v1225_v24 = vpop.eup %1224 }
0x1319   :  { %v620_v25 = vmul.f32 0.5, %v1225_v24 }
0x131b   :  { %v621_v26 = vadd.f32 0.5, %v620_v25 }
0x131d   :  { %v622_v27 = vsel %vm1433_vm4, %v1225_v24, %v621_v26 }
0x131e   :  { %624 = vrot.lane.b32.xlu0 %v622_v27, %s1335_s22 }
0x1390   :  { %v625_v28 = vpop.permute.xlu0 %624 }
0x1391   :  { %v627_v30 = vmul.f32 %v625_v28, %v622_v27 }
0x1393   :  { %629 = vrot.lane.b32.xlu1 %v627_v30, %s1338_s2 }
0x1405   :  { %v630_v12 = vpop.permute.xlu1 %629 }
0x1406   :  { %v632_v31 = vadd.f32 %v630_v12, %v622_v27 }
0x1408   :  { %1226 = vtanh.f32 %v632_v31  ;;  %v675_v51 = vrot.slane %v632_v31, 6 }
0x140e   :  { %v1227_v32 = vpop.eup %1226 }
0x140f   :  { %635 = vrot.lane.b32.xlu2 %v1227_v32, %s1335_s22 }
0x1469   :  { %v636_v33 = vpop.permute.xlu2 %635 }
0x146a   :  { %v1591_v34 = vmul.f32 %v636_v33, %v622_v27 }
0x146c   :  { %v644_v36 = vpack.c.bf16 %v1591_v34, %v1591_v34 }
0x146e   :  { %646 = vrot.lane.b32.xlu0 %v644_v36, %s1338_s2 }
0x14e0   :  { %v647_v37 = vpop.permute.xlu0 %646 }
0x14e1   :  { %1156 = vmatmul.msk.bf16.vlgmr.msra.gmra.mxu3 %vm105_vm5, %v647_v37 }
0x1564   :  { %v660_v38 = vpop.f32.mrf.mxu3 }
0x1565   :  { %v665_v40 = vrot.slane %v660_v38, 6 }
0x1567   :  { %v667_v41 = vadd.f32 %v665_v40, %v1581_v20 }
0x1569   :  { %v668_v42 = vmul.f32 0.5, %v667_v41 }
0x156b   :  { %v669_v43 = vsel %vm1433_vm4, %v667_v41, %v668_v42 }
0x156c   :  { %1228 = vtanh.f32 %v669_v43  ;;  %v662_v44 = vpop.f32.mrf.mxu3 }
0x1572   :  { %v1229_v45 = vpop.eup %1228 }
0x1573   :  { %v671_v46 = vmul.f32 0.5, %v1229_v45 }
0x1575   :  { %v672_v47 = vadd.f32 0.5, %v671_v46  ;;  %v1640_v46 = vadd.f32 %v1578_v18, %v584_v21 }
0x1577   :  { %v673_v48 = vsel %vm1433_vm4, %v1229_v45, %v672_v47 }
0x1578   :  { %679 = vrot.lane.b32.xlu1 %v673_v48, %s1335_s22  ;;  %v677_v52 = vmul.f32 %v675_v51, %v673_v48 }
0x15ea   :  { %v680_v49 = vpop.permute.xlu1 %679 }
0x15eb   :  { %v682_v9 = vmul.f32 %v680_v49, %v673_v48 }
0x15ed   :  { %684 = vrot.lane.b32.xlu2 %v682_v9, %s1338_s2 }
0x1647   :  { %v685_v53 = vpop.permute.xlu2 %684 }
0x1648   :  { %v687_v54 = vadd.f32 %v685_v53, %v677_v52 }
0x164a   :  { %1230 = vtanh.f32 %v687_v54  ;;  %v731_v5 = vrot.slane %v687_v54, 6 }
0x1650   :  { %v1231_v55 = vpop.eup %1230 }
0x1651   :  { %690 = vrot.lane.b32.xlu0 %v1231_v55, %s1335_s22 }
0x16c3   :  { %v691_v56 = vpop.permute.xlu0 %690 }
0x16c4   :  { %v1605_v39 = vmul.f32 %v691_v56, %v673_v48 }
0x16c6   :  { %v699_v58 = vpack.c.bf16 %v1605_v39, %v1605_v39 }
0x16c8   :  { %v701_v59 = vrot.slane %v699_v58, 1 }
0x16ca   :  { %702 = vrot.lane.b32.xlu1 %v701_v59, %s1338_s2 }
0x173c   :  { %v703_v60 = vpop.permute.xlu1 %702 }
0x173d   :  { %1157 = vmatmul.msk.bf16.vlgmr.msrb.gmra.mxu0 %vm105_vm5, %v703_v60 }
0x17ba   :  { %v716_v29 = vpop.f32.mrf.mxu0 }
0x17bb   :  { %v721_v35 = vrot.slane %v716_v29, 4 }
0x17bd   :  { %v723_v61 = vadd.f32 %v721_v35, %v1581_v20 }
0x17bf   :  { %v724_v62 = vmul.f32 0.5, %v723_v61 }
0x17c1   :  { %v725_v50 = vsel %vm1433_vm4, %v723_v61, %v724_v62 }
0x17c2   :  { %1232 = vtanh.f32 %v725_v50  ;;  %v718_v0 = vpop.f32.mrf.mxu0 }
0x17c8   :  { %v1233_v1 = vpop.eup %1232 }
0x17c9   :  { %v727_v57 = vmul.f32 0.5, %v1233_v1 }
0x17cb   :  { %v728_v2 = vadd.f32 0.5, %v727_v57 }
0x17cd   :  { %v729_v3 = vsel %vm1433_vm4, %v1233_v1, %v728_v2 }
0x17ce   :  { %735 = vrot.lane.b32.xlu2 %v729_v3, %s1335_s22  ;;  %v733_v6 = vmul.f32 %v731_v5, %v729_v3 }
0x1828   :  { %v736_v10 = vpop.permute.xlu2 %735 }
0x1829   :  { %v738_v4 = vmul.f32 %v736_v10, %v729_v3 }
0x182b   :  { %740 = vrot.lane.b32.xlu0 %v738_v4, %s1338_s2 }
0x189d   :  { %v741_v8 = vpop.permute.xlu0 %740 }
0x189e   :  { %v743_v7 = vadd.f32 %v741_v8, %v733_v6 }
0x18a0   :  { %1234 = vtanh.f32 %v743_v7  ;;  %v787_v36 = vrot.slane %v743_v7, 6 }
0x18a6   :  { %v1235_v11 = vpop.eup %1234 }
0x18a7   :  { %746 = vrot.lane.b32.xlu1 %v1235_v11, %s1335_s22 }
0x1919   :  { %v747_v13 = vpop.permute.xlu1 %746 }
0x191a   :  { %v1619_v14 = vmul.f32 %v747_v13, %v729_v3 }
0x191c   :  { %v755_v16 = vpack.c.bf16 %v1619_v14, %v1619_v14 }
0x191e   :  { %v757_v17 = vrot.slane %v755_v16, 2 }
0x1920   :  { %758 = vrot.lane.b32.xlu2 %v757_v17, %s1338_s2 }
0x197a   :  { %v759_v19 = vpop.permute.xlu2 %758 }
0x197b   :  { %1158 = vmatmul.msk.bf16.vlgmr.msrb.gmra.mxu1 %vm105_vm5, %v759_v19 }
0x19f8   :  { %v772_v22 = vpop.f32.mrf.mxu1 }
0x19f9   :  { %v777_v23 = vrot.slane %v772_v22, 2 }
0x19fb   :  { %v779_v24 = vadd.f32 %v777_v23, %v1581_v20 }
0x19fd   :  { %v780_v25 = vmul.f32 0.5, %v779_v24 }
0x19ff   :  { %v781_v26 = vsel %vm1433_vm4, %v779_v24, %v780_v25 }
0x1a00   :  { %1236 = vtanh.f32 %v781_v26  ;;  %v774_v27 = vpop.f32.mrf.mxu1 }
0x1a06   :  { %v1237_v28 = vpop.eup %1236 }
0x1a07   :  { %v783_v30 = vmul.f32 0.5, %v1237_v28 }
0x1a09   :  { %v784_v12 = vadd.f32 0.5, %v783_v30 }
0x1a0b   :  { %v785_v31 = vsel %vm1433_vm4, %v1237_v28, %v784_v12 }
0x1a0c   :  { %791 = vrot.lane.b32.xlu0 %v785_v31, %s1335_s22  ;;  %v789_v20 = vmul.f32 %v787_v36, %v785_v31 }
0x1a7e   :  { %v792_v32 = vpop.permute.xlu0 %791 }
0x1a7f   :  { %v794_v33 = vmul.f32 %v792_v32, %v785_v31 }
0x1a81   :  { %796 = vrot.lane.b32.xlu1 %v794_v33, %s1338_s2 }
0x1af3   :  { %v797_v37 = vpop.permute.xlu1 %796 }
0x1af4   :  { %v799_v38 = vadd.f32 %v797_v37, %v789_v20 }
0x1af6   :  { %1238 = vtanh.f32 %v799_v38  ;;  %v840_v58 = vrot.slane %v799_v38, 6 }
0x1afc   :  { %v1239_v40 = vpop.eup %1238 }
0x1afd   :  { %802 = vrot.lane.b32.xlu2 %v1239_v40, %s1335_s22 }
0x1b57   :  { %v803_v41 = vpop.permute.xlu2 %802 }
0x1b58   :  { %v1633_v42 = vmul.f32 %v803_v41, %v785_v31 }
0x1b5a   :  { %v811_v43 = vpack.c.bf16 %v1633_v42, %v1633_v42 }
0x1b5c   :  { %v813_v44 = vrot.slane %v811_v43, 3 }
0x1b5e   :  { %814 = vrot.lane.b32.xlu0 %v813_v44, %s1338_s2 }
0x1bd0   :  { %v815_v45 = vpop.permute.xlu0 %814 }
0x1bd1   :  { %1159 = vmatmul.msk.bf16.vlgmr.msrb.gmra.mxu2 %vm105_vm5, %v815_v45 }
0x1c54   :  { %v828_v47 = vpop.f32.mrf.mxu2 }
0x1c55   :  { %v832_v48 = vadd.f32 %v828_v47, %v1640_v46 }
0x1c57   :  { %v833_v49 = vmul.f32 0.5, %v832_v48 }
0x1c59   :  { %v834_v9 = vsel %vm1433_vm4, %v832_v48, %v833_v49 }
0x1c5a   :  { %1240 = vtanh.f32 %v834_v9 }
0x1c5c   :  { %v830_v51 = vpop.f32.mrf.mxu2 }
0x1c60   :  { %v1241_v52 = vpop.eup %1240 }
0x1c61   :  { %v836_v53 = vmul.f32 0.5, %v1241_v52 }
0x1c63   :  { %v837_v54 = vadd.f32 0.5, %v836_v53 }
0x1c65   :  { %v838_v55 = vsel %vm1433_vm4, %v1241_v52, %v837_v54 }
0x1c66   :  { %844 = vrot.lane.b32.xlu1 %v838_v55, %s1335_s22  ;;  %v842_v59 = vmul.f32 %v840_v58, %v838_v55 }
0x1cd8   :  { %v845_v56 = vpop.permute.xlu1 %844 }
0x1cd9   :  { %v847_v18 = vmul.f32 %v845_v56, %v838_v55 }
0x1cdb   :  { %849 = vrot.lane.b32.xlu2 %v847_v18, %s1338_s2 }
0x1d35   :  { %v850_v60 = vpop.permute.xlu2 %849 }
0x1d36   :  { %v852_v29 = vadd.f32 %v850_v60, %v842_v59 }
0x1d38   :  { %1242 = vtanh.f32 %v852_v29  ;;  %v895_v16 = vrot.slane %v852_v29, 6 }
0x1d3e   :  { %v1243_v35 = vpop.eup %1242 }
0x1d3f   :  { %855 = vrot.lane.b32.xlu0 %v1243_v35, %s1335_s22 }
0x1db1   :  { %v856_v61 = vpop.permute.xlu0 %855 }
0x1db2   :  { %v1650_v62 = vmul.f32 %v856_v61, %v838_v55 }
0x1db4   :  { %v864_v50 = vpack.c.bf16 %v1650_v62, %v1650_v62 }
0x1db6   :  { %866 = vrot.lane.b32.xlu1 %v864_v50, %s1338_s2 }
0x1e28   :  { %v867_v0 = vpop.permute.xlu1 %866 }
0x1e29   :  { %1160 = vmatmul.msk.bf16.vlgmr.msrb.gmra.mxu3 %vm105_vm5, %v867_v0 }
0x1eac   :  { %v880_v1 = vpop.f32.mrf.mxu3 }
0x1ead   :  { %v885_v57 = vrot.slane %v880_v1, 6 }
0x1eaf   :  { %v887_v2 = vadd.f32 %v885_v57, %v1640_v46 }
0x1eb1   :  { %v888_v3 = vmul.f32 0.5, %v887_v2 }
0x1eb3   :  { %v889_v10 = vsel %vm1433_vm4, %v887_v2, %v888_v3 }
0x1eb4   :  { %1244 = vtanh.f32 %v889_v10  ;;  %v882_v4 = vpop.f32.mrf.mxu3 }
0x1eb5   :  { %v1179_v4 = vld [vmem:[%s1747_s7 + $0x8] sm:$0xff] }
0x1eb6   :  { %1071 = vmatpush.bf16.msra.mxu2 %v1179_v4 }
0x1eba   :  { %v1245_v5 = vpop.eup %1244 }
0x1ebb   :  { %v891_v6 = vmul.f32 0.5, %v1245_v5 }
0x1ebd   :  { %v892_v8 = vadd.f32 0.5, %v891_v6 }
0x1ebf   :  { %v893_v7 = vsel %vm1433_vm4, %v1245_v5, %v892_v8 }
0x1ec0   :  { %899 = vrot.lane.b32.xlu2 %v893_v7, %s1335_s22  ;;  %v897_v17 = vmul.f32 %v895_v16, %v893_v7 }
0x1f1a   :  { %v900_v11 = vpop.permute.xlu2 %899 }
0x1f1b   :  { %v902_v13 = vmul.f32 %v900_v11, %v893_v7 }
0x1f1d   :  { %904 = vrot.lane.b32.xlu0 %v902_v13, %s1338_s2 }
0x1f8f   :  { %v905_v19 = vpop.permute.xlu0 %904 }
0x1f90   :  { %v907_v21 = vadd.f32 %v905_v19, %v897_v17  ;;  %v1191_v19 = vld [vmem:[%s1748_s8] ss:$0 sm:$0xff] }
0x1f92   :  { %1246 = vtanh.f32 %v907_v21  ;;  %v951_v43 = vrot.slane %v907_v21, 6 }
0x1f98   :  { %v1247_v22 = vpop.eup %1246 }
0x1f99   :  { %910 = vrot.lane.b32.xlu1 %v1247_v22, %s1335_s22 }
0x200b   :  { %v911_v23 = vpop.permute.xlu1 %910 }
0x200c   :  { %v1664_v24 = vmul.f32 %v911_v23, %v893_v7 }
0x200e   :  { %v919_v25 = vpack.c.bf16 %v1664_v24, %v1664_v24 }
0x2010   :  { %v921_v26 = vrot.slane %v919_v25, 1 }
0x2012   :  { %922 = vrot.lane.b32.xlu2 %v921_v26, %s1338_s2 }
0x206c   :  { %v923_v27 = vpop.permute.xlu2 %922 }
0x206d   :  { %1161 = vmatmul.msk.bf16.vlgmr.msra.gmra.mxu0 %vm105_vm5, %v923_v27 }
0x20ea   :  { %v936_v28 = vpop.f32.mrf.mxu0 }
0x20eb   :  { %v941_v30 = vrot.slane %v936_v28, 4 }
0x20ed   :  { %v943_v12 = vadd.f32 %v941_v30, %v1640_v46 }
0x20ef   :  { %v944_v31 = vmul.f32 0.5, %v943_v12 }
0x20f1   :  { %v945_v32 = vsel %vm1433_vm4, %v943_v12, %v944_v31 }
0x20f2   :  { %1248 = vtanh.f32 %v945_v32  ;;  %v938_v33 = vpop.f32.mrf.mxu0 }
0x20f8   :  { %v1249_v36 = vpop.eup %1248 }
0x20f9   :  { %v947_v20 = vmul.f32 0.5, %v1249_v36 }
0x20fb   :  { %v948_v37 = vadd.f32 0.5, %v947_v20 }
0x20fd   :  { %v949_v38 = vsel %vm1433_vm4, %v1249_v36, %v948_v37 }
0x20fe   :  { %955 = vrot.lane.b32.xlu0 %v949_v38, %s1335_s22  ;;  %v953_v44 = vmul.f32 %v951_v43, %v949_v38 }
0x2170   :  { %v956_v40 = vpop.permute.xlu0 %955 }
0x2171   :  { %v958_v41 = vmul.f32 %v956_v40, %v949_v38 }
0x2173   :  { %960 = vrot.lane.b32.xlu1 %v958_v41, %s1338_s2 }
0x21e5   :  { %v961_v45 = vpop.permute.xlu1 %960 }
0x21e6   :  { %v963_v47 = vadd.f32 %v961_v45, %v953_v44 }
0x21e8   :  { %1250 = vtanh.f32 %v963_v47 }
0x21ee   :  { %v1251_v48 = vpop.eup %1250 }
0x21ef   :  { %966 = vrot.lane.b32.xlu2 %v1251_v48, %s1335_s22 }
0x2249   :  { %v967_v49 = vpop.permute.xlu2 %966 }
0x224a   :  { %v969_v9 = vmul.f32 %v967_v49, %v949_v38 }
0x224c   :  { %v975_v51 = vpack.c.bf16 %v969_v9, %v969_v9 }
0x224e   :  { %v977_v52 = vrot.slane %v975_v51, 2 }
0x2250   :  { %978 = vrot.lane.b32.xlu0 %v977_v52, %s1338_s2 }
0x22c2   :  { %v979_v53 = vpop.permute.xlu0 %978 }
0x22c3   :  { %1162 = vmatmul.msk.bf16.vlgmr.msra.gmra.mxu1 %vm105_vm5, %v979_v53 }
0x2340   :  { %v992_v54 = vpop.f32.mrf.mxu1 }
0x2341   :  { %v997_v55 = vrot.slane %v992_v54, 2 }
0x2343   :  { %v999_v56 = vadd.f32 %v997_v55, %v1640_v46 }
0x2345   :  { %v1000_v18 = vmul.f32 0.5, %v999_v56 }
0x2347   :  { %v1001_v58 = vsel %vm1433_vm4, %v999_v56, %v1000_v18 }
0x2348   :  { %1252 = vtanh.f32 %v1001_v58  ;;  %v994_v59 = vpop.f32.mrf.mxu1 }
0x234e   :  { %v1253_v60 = vpop.eup %1252 }
0x234f   :  { %v1003_v29 = vmul.f32 0.5, %v1253_v60 }
0x2351   :  { %v1004_v35 = vadd.f32 0.5, %v1003_v29 }
0x2353   :  { %v1005_v61 = vsel %vm1433_vm4, %v1253_v60, %v1004_v35 }
0x2354   :  { %1011 = vrot.lane.b32.xlu1 %v1005_v61, %s1335_s22 }
0x235c   :  { %640 = vrot.lane.b32.xlu1 %v1591_v34, %s1338_s2 }
0x2364   :  { %807 = vrot.lane.b32.xlu1 %v1633_v42, %s1338_s2  ;;  %v1007_v42 = vrot.slane %v963_v47, 6 }
0x2366   :  { %v1009_v1 = vmul.f32 %v1007_v42, %v1005_v61 }
0x236c   :  { %971 = vrot.lane.b32.xlu1 %v969_v9, %s1338_s2 }
0x23c6   :  { %v1012_v46 = vpop.permute.xlu1 %1011 }
0x23c7   :  { %v1014_v50 = vmul.f32 %v1012_v46, %v1005_v61 }
0x23c9   :  { %1016 = vrot.lane.b32.xlu2 %v1014_v50, %s1338_s2 }
0x23ce   :  { %v641_v0 = vpop.permute.xlu1 %640 }
0x23cf   :  { %643 = vst.msk [vmem:[#allocation2] sm:$0x3] %vm149_vm6, %v641_v0 }
0x23d1   :  { %695 = vrot.lane.b32.xlu2 %v1605_v39, %s1338_s2 }
0x23d6   :  { %v808_v15 = vpop.permute.xlu1 %807 }
0x23d7   :  { %810 = vst.msk [vmem:[#allocation2] sm:$0xc0] %vm319_vm7, %v808_v15 }
0x23d9   :  { %860 = vrot.lane.b32.xlu2 %v1650_v62, %s1338_s2 }
0x23de   :  { %v972_v34 = vpop.permute.xlu1 %971 }
0x23df   :  { %974 = vst.msk [vmem:[#allocation2 + $0x8] sm:$0x30] %vm262_vm8, %v972_v34 }
0x2423   :  { %v1017_v57 = vpop.permute.xlu2 %1016 }
0x2424   :  { %v1019_v2 = vadd.f32 %v1017_v57, %v1009_v1 }
0x2426   :  { %1254 = vtanh.f32 %v1019_v2  ;;  %1034 = vrot.lane.b32.xlu1 %v1019_v2, %s1339_s4 }
0x242b   :  { %v696_v3 = vpop.permute.xlu2 %695 }
0x242c   :  { %v1255_v10 = vpop.eup %1254  ;;  %698 = vst.msk [vmem:[#allocation2] sm:$0xc] %vm205_vm9, %v696_v3 }
0x242d   :  { %1022 = vrot.lane.b32.xlu0 %v1255_v10, %s1335_s22  ;;  %s1340_s22 = smov [#allocation6]  }
0x242e   :  { %s1088_s23 = sshll.u32 %s1340_s22, 4  ;;  %s1089_s23 = int_to_ptr.vmem [resolvable:$true] %s1088_s23 }
0x2433   :  { %v861_v39 = vpop.permute.xlu2 %860 }
0x2434   :  { %863 = vst.msk [vmem:[#allocation2 + $0x8] sm:$0x3] %vm149_vm6, %v861_v39 }
0x2435   :  { %751 = vrot.lane.b32.xlu0 %v1619_v14, %s1338_s2 }
0x243d   :  { %915 = vrot.lane.b32.xlu0 %v1664_v24, %s1338_s2 }
0x2445   :  { %543 = vrot.lane.b32.xlu0 %v1552_v63, %s1339_s4  ;;  %v1178_v63 = vld [vmem:[%s1747_s7] sm:$0xff]  ;;  %s1341_s7 = smov [#allocation7]  }
0x2446   :  { %1072 = vmatpush.bf16.msra.mxu2 %v1178_v63  ;;  %s1101_s27 = sshll.u32 %s1341_s7, 4  ;;  %s1102_s27 = int_to_ptr.vmem [resolvable:$true] %s1101_s27 }
0x2498   :  { %v1035_v62 = vpop.permute.xlu1 %1034 }
0x2499   :  { %1038 = vst.msk [vmem:[#allocation7 - $0x4] sm:$0xc0] %vm319_vm7, %v1035_v62 }
0x249f   :  { %v1023_v5 = vpop.permute.xlu0 %1022 }
0x24a0   :  { %v1025_v6 = vmul.f32 %v1023_v5, %v1005_v61 }
0x24a2   :  { %1027 = vrot.lane.b32.xlu2 %v1025_v6, %s1338_s2 }
0x24a7   :  { %v752_v8 = vpop.permute.xlu0 %751 }
0x24a8   :  { %754 = vst.msk [vmem:[#allocation2] sm:$0x30] %vm262_vm8, %v752_v8 }
0x24af   :  { %v916_v14 = vpop.permute.xlu0 %915  ;;  %v1039_v13 = vld [vmem:[#allocation2] sm:$0xff] }
0x24b0   :  { %918 = vst.msk [vmem:[#allocation2 + $0x8] sm:$0xc] %vm205_vm9, %v916_v14 }
0x24b7   :  { %v544_v7 = vpop.permute.xlu0 %543 }
0x24b8   :  { %546 = vst.msk [vmem:[#allocation7 - $0x6] sm:$0xc0] %vm319_vm7, %v544_v7 }
0x24b9   :  { %1109 = dma.vmem_to_hbm [thread:$0]  %s1102_s27, 64, %s1104_s30, [#allocation8], %s1338_s2, %s1338_s2, %s1342_s5  }
0x24fc   :  { %v1028_v11 = vpop.permute.xlu2 %1027 }
0x24fd   :  { %1030 = vst.msk [vmem:[#allocation2 + $0x8] sm:$0xc0] %vm319_vm7, %v1028_v11 }
0x24fe   :  { %1032 = vst.msk [vmem:[#allocation6 - $0x4] sm:$0xc0] %vm319_vm7, %v1028_v11 }
0x24ff   :  { %1096 = dma.vmem_to_hbm [thread:$0]  %s1089_s23, 64, %s1091_s26, [#allocation5], %s1338_s2, %s1338_s2, %s1342_s5  }
0x2504   :  { %v1040_v16 = vld [vmem:[#allocation2 + $0x8] sm:$0xff] }
0x2505   :  { %v1041_v17 = vpack.c.bf16 %v1040_v16, %v1039_v13 }
0x2507   :  { %1171 = vmatmul.msk.bf16.vlgmr.msra.gmra.mxu2 %vm105_vm5, %v1041_v17 }
0x258a   :  { %v1074_v21 = vpop.f32.mrf.mxu2 }
0x258b   :  { %v1075_v22 = vadd.f32 %v1191_v19, %v1074_v21 }
0x258d   :  { %1080 = vst.msk [vmem:[%s1749_s9] sm:$0xff] %vm1079_vm10, %v1075_v22 }
0x2592   :  { %v1076_v23 = vpop.f32.mrf.mxu2 }
0x2593   :  { %v1077_v24 = vadd.f32 %v1191_v19, %v1076_v23 }
0x2595   :  { %1081 = vst.msk [vmem:[%s1749_s9 + $0x8] sm:$0xff] %vm1079_vm10, %v1077_v24 }
0x2596   :  { %1330 = dma.done.wait [#allocation5], 64  }
0x2597   :  { %1331 = vsyncadd [#allocation5], 4294967232 }
0x2598   :  { %1332 = dma.done.wait [#allocation8], 64  }
0x2599   :  { %1333 = vsyncadd [#allocation8], 4294967232 }
0x259a   :  { %1120 = vsyncpa [#allocation4], 1 }
0x259b   :  { %1121 = vsyncpa [#allocation5], 1 }
0x259c   :  { %1122 = vsyncpa [#allocation8], 1 }

</bundles_post_ra>
